<compile_context>
chip_gen: v6e
topology: v6e:2x2x1
jax: 0.10.0
libtpu: 0.0.40
codegen_flags: <defaults>
</compile_context>

<pallas_src>
import functools
import math

import jax
import jax.numpy as jnp
from jax.experimental import pallas as pl
from jax.experimental.pallas import tpu as pltpu


# ---------------------------------------------------------------------------
# Fused decoder-block kernel (one grid step = one batch element)
# ---------------------------------------------------------------------------
def _decoder_block_kernel(
    x_ref, val_ref, key_ref, tmask_ref, smask_ref,
    s_wq, s_wk, s_wv, s_bq, s_bk, s_bv, s_wo, s_bo,
    c_wq, c_wk, c_wv, c_bq, c_bk, c_bv, c_wo, c_bo,
    n0_g, n0_b, n1_g, n1_b, n2_g, n2_b,
    w1T, b1, w2T, b2,
    o_ref, *, num_heads,
):
    x = x_ref[0]        # (L, E)
    k_in = key_ref[0]   # (S, E)
    v_in = val_ref[0]   # (S, E)

    def mha(q_in, kk, vv, mask, wq, wk, wv, bq, bk, bv, wo, bo):
        # wq/wk/wv/wo: (E, E) "transposed" weights (y = x @ W), b*: (1, E)
        H = num_heads
        E = q_in.shape[-1]
        Dh = E // H
        scale = 1.0 / math.sqrt(Dh)

        # Full-width projections: big 2D MXU matmuls, no per-head broadcast of
        # activations.  Softmax scale folded into Q once.
        q = (jnp.dot(q_in, wq[...], preferred_element_type=jnp.float32) + bq[...]) * scale
        k = jnp.dot(kk, wk[...], preferred_element_type=jnp.float32) + bk[...]
        v = jnp.dot(vv, wv[...], preferred_element_type=jnp.float32) + bv[...]
        wo_full = wo[...]

        # Per-head attention (statically unrolled, H is small).  The per-head
        # output-projection contributions o_h @ Wo[h] are accumulated directly,
        # so no concatenate / head stacking is needed.
        out = None
        for h in range(H):
            sl = slice(h * Dh, (h + 1) * Dh)
            qh, kh, vh = q[:, sl], k[:, sl], v[:, sl]
            s = jnp.einsum("ld,sd->ls", qh, kh,
                           preferred_element_type=jnp.float32)         # (Lq, Skv)
            s = s + mask
            s = s - jnp.max(s, axis=-1, keepdims=True)
            p = jnp.exp(s)
            p = p * pl.reciprocal(jnp.sum(p, axis=-1, keepdims=True), approx=True)
            oh = jnp.einsum("ls,sd->ld", p, vh,
                            preferred_element_type=jnp.float32)        # (Lq, Dh)
            contrib = jnp.dot(oh, wo_full[sl, :],
                              preferred_element_type=jnp.float32)      # (Lq, E)
            out = contrib if out is None else out + contrib
        return out + bo[...]

    def add_ln(a, b, g, beta):
        y = a + b
        mu = jnp.mean(y, axis=-1, keepdims=True)
        var = jnp.mean((y - mu) * (y - mu), axis=-1, keepdims=True)
        return (y - mu) * jax.lax.rsqrt(var + 1e-5) * g[...] + beta[...]

    # self attention + residual + norm (dropout = identity in eval)
    attn = mha(x, x, x, tmask_ref[...],
               s_wq, s_wk, s_wv, s_bq, s_bk, s_bv, s_wo, s_bo)
    query = add_ln(attn, x, n0_g, n0_b)

    # TransformerBlock: cross attention + residual + norm1
    attn2 = mha(query, k_in, v_in, smask_ref[...],
                c_wq, c_wk, c_wv, c_bq, c_bk, c_bv, c_wo, c_bo)
    h = add_ln(attn2, query, n1_g, n1_b)

    # feed-forward + residual + norm2
    ff = jnp.dot(h, w1T[...], preferred_element_type=jnp.float32) + b1[...]
    ff = jnp.maximum(ff, 0.0)
    ff = jnp.dot(ff, w2T[...], preferred_element_type=jnp.float32) + b2[...]
    out = add_ln(ff, h, n2_g, n2_b)

    # TODO(synk): at realistic E (multiple of 128) the (1, L, E) output block is
    # already lane dense; at toy E=32 this produces masked stores (acceptable here).
    o_ref[0] = out.astype(o_ref.dtype)


# ---------------------------------------------------------------------------
# Host-side wrapper
# ---------------------------------------------------------------------------
def decoder_block_forward(params, x, value, key, src_mask, tar_mask, num_heads):
    B, L, E = x.shape
    S = value.shape[1]
    assert E % num_heads == 0
    H1 = params["ff_w1T"].shape[1]

    def rep(shape):  # replicated (batch-invariant) operand, full-array block
        nd = len(shape)
        return pl.BlockSpec(shape, lambda b, _nd=nd: (0,) * _nd)

    def batched(n, e):
        return pl.BlockSpec((1, n, e), lambda b: (b, 0, 0))

    def attn_specs():
        return [rep((E, E))] * 3 + [rep((1, E))] * 3 + [rep((E, E)), rep((1, E))]

    in_specs = (
        [batched(L, E), batched(S, E), batched(S, E), rep((L, L)), rep((L, S))]
        + attn_specs() + attn_specs()
        + [rep((1, E))] * 6
        + [rep((E, H1)), rep((1, H1)), rep((H1, E)), rep((1, E))]
    )

    sa = params["self_attn"]
    ca = params["cross_attn"]
    args = (
        x, value, key, tar_mask, src_mask,
        sa["wqT"], sa["wkT"], sa["wvT"], sa["bq"], sa["bk"], sa["bv"], sa["woT"], sa["bo"],
        ca["wqT"], ca["wkT"], ca["wvT"], ca["bq"], ca["bk"], ca["bv"], ca["woT"], ca["bo"],
        params["norm_g"], params["norm_b"],
        params["tb_norm1_g"], params["tb_norm1_b"],
        params["tb_norm2_g"], params["tb_norm2_b"],
        params["ff_w1T"], params["ff_b1"], params["ff_w2T"], params["ff_b2"],
    )

    return pl.pallas_call(
        functools.partial(_decoder_block_kernel, num_heads=num_heads),
        out_shape=jax.ShapeDtypeStruct((B, L, E), x.dtype),
        grid=(B,),
        in_specs=in_specs,
        out_specs=pl.BlockSpec((1, L, E), lambda b: (b, 0, 0)),
        compiler_params=pltpu.CompilerParams(dimension_semantics=("parallel",)),
    )(*args)


# ---------------------------------------------------------------------------
# Pure-JAX reference (for correctness check)
# ---------------------------------------------------------------------------
def _mha_ref(q_in, k_in, v_in, mask, p, H):
    B, L, E = q_in.shape
    S = k_in.shape[1]
    Dh = E // H
    q = q_in @ p["wqT"] + p["bq"]
    k = k_in @ p["wkT"] + p["bk"]
    v = v_in @ p["wvT"] + p["bv"]
    q = q.reshape(B, L, H, Dh).transpose(0, 2, 1, 3)
    k = k.reshape(B, S, H, Dh).transpose(0, 2, 1, 3)
    v = v.reshape(B, S, H, Dh).transpose(0, 2, 1, 3)
    s = jnp.einsum("bhld,bhsd->bhls", q, k) / jnp.sqrt(Dh) + mask
    p_attn = jax.nn.softmax(s, axis=-1)
    o = jnp.einsum("bhls,bhsd->bhld", p_attn, v).transpose(0, 2, 1, 3).reshape(B, L, E)
    return o @ p["woT"] + p["bo"]


def _ln_ref(x, g, b):
    mu = jnp.mean(x, axis=-1, keepdims=True)
    var = jnp.mean((x - mu) ** 2, axis=-1, keepdims=True)
    return (x - mu) / jnp.sqrt(var + 1e-5) * g + b


def decoder_block_ref(params, x, value, key, src_mask, tar_mask, H):
    attn = _mha_ref(x, x, x, tar_mask, params["self_attn"], H)
    query = _ln_ref(attn + x, params["norm_g"], params["norm_b"])
    attn2 = _mha_ref(query, key, value, src_mask, params["cross_attn"], H)
    h = _ln_ref(attn2 + query, params["tb_norm1_g"], params["tb_norm1_b"])
    ff = jnp.maximum(h @ params["ff_w1T"] + params["ff_b1"], 0.0) @ params["ff_w2T"] + params["ff_b2"]
    return _ln_ref(ff + h, params["tb_norm2_g"], params["tb_norm2_b"])


# ---------------------------------------------------------------------------
# Deterministic parameter init
# ---------------------------------------------------------------------------
def _init_mha_params(key, E):
    ks = jax.random.split(key, 8)
    scale = 0.05
    return {
        "wqT": scale * jax.random.normal(ks[0], (E, E), jnp.float32),
        "wkT": scale * jax.random.normal(ks[1], (E, E), jnp.float32),
        "wvT": scale * jax.random.normal(ks[2], (E, E), jnp.float32),
        "bq": scale * jax.random.normal(ks[3], (1, E), jnp.float32),
        "bk": scale * jax.random.normal(ks[4], (1, E), jnp.float32),
        "bv": scale * jax.random.normal(ks[5], (1, E), jnp.float32),
        "woT": scale * jax.random.normal(ks[6], (E, E), jnp.float32),
        "bo": scale * jax.random.normal(ks[7], (1, E), jnp.float32),
    }


def init_params(key, E, fe):
    k0, k1, k2, k3, k4, k5 = jax.random.split(key, 6)
    H1 = fe * E
    return {
        "self_attn": _init_mha_params(k0, E),
        "cross_attn": _init_mha_params(k1, E),
        "norm_g": jnp.ones((1, E), jnp.float32),
        "norm_b": jnp.zeros((1, E), jnp.float32),
        "tb_norm1_g": jnp.ones((1, E), jnp.float32),
        "tb_norm1_b": jnp.zeros((1, E), jnp.float32),
        "tb_norm2_g": jnp.ones((1, E), jnp.float32),
        "tb_norm2_b": jnp.zeros((1, E), jnp.float32),
        "ff_w1T": 0.05 * jax.random.normal(k2, (E, H1), jnp.float32),
        "ff_b1": 0.05 * jax.random.normal(k3, (1, H1), jnp.float32),
        "ff_w2T": 0.05 * jax.random.normal(k4, (H1, E), jnp.float32),
        "ff_b2": 0.05 * jax.random.normal(k5, (1, E), jnp.float32),
    }


if __name__ == "__main__":
    B, L, S, E, HEADS, FE = 2, 8, 16, 32, 4, 4

    root = jax.random.PRNGKey(0)
    kp, kx, kv, kk = jax.random.split(root, 4)
    params = init_params(kp, E, FE)

    x = jax.random.normal(kx, (B, L, E), jnp.float32)        # decoder input
    value = jax.random.normal(kv, (B, S, E), jnp.float32)    # encoder output (V)
    key_t = jax.random.normal(kk, (B, S, E), jnp.float32)    # encoder output (K)

    # causal target mask (additive), no source masking
    causal = jnp.tril(jnp.ones((L, L), jnp.float32))
    tar_mask = jnp.where(causal > 0, 0.0, -1e9).astype(jnp.float32)
    src_mask = jnp.zeros((L, S), jnp.float32)

    fwd = jax.jit(functools.partial(decoder_block_forward, num_heads=HEADS))
    out = fwd(params, x, value, key_t, src_mask, tar_mask)
    out = jax.block_until_ready(out)

    ref = decoder_block_ref(params, x, value, key_t, src_mask, tar_mask, HEADS)
    assert out.shape == (B, L, E)
    # tolerance loosened slightly vs f32-exact because softmax uses the EUP
    # approx reciprocal (pl.reciprocal(..., approx=True)).
    max_diff = float(jnp.max(jnp.abs(out - ref)))
    assert jnp.allclose(out, ref, atol=5e-3, rtol=5e-3), max_diff

    print("KERNEL_OK")
</pallas_src>

<mosaic_0001>
module attributes {stable_mosaic.version = 11 : i64} {
  func.func @_decoder_block_kernel(%arg0: i32, %arg1: memref<1x8x32xf32, #tpu.memory_space<vmem>>, %arg2: memref<1x16x32xf32, #tpu.memory_space<vmem>>, %arg3: memref<1x16x32xf32, #tpu.memory_space<vmem>>, %arg4: memref<8x8xf32, #tpu.memory_space<vmem>>, %arg5: memref<8x16xf32, #tpu.memory_space<vmem>>, %arg6: memref<32x32xf32, #tpu.memory_space<vmem>>, %arg7: memref<32x32xf32, #tpu.memory_space<vmem>>, %arg8: memref<32x32xf32, #tpu.memory_space<vmem>>, %arg9: memref<1x32xf32, #tpu.memory_space<vmem>>, %arg10: memref<1x32xf32, #tpu.memory_space<vmem>>, %arg11: memref<1x32xf32, #tpu.memory_space<vmem>>, %arg12: memref<32x32xf32, #tpu.memory_space<vmem>>, %arg13: memref<1x32xf32, #tpu.memory_space<vmem>>, %arg14: memref<32x32xf32, #tpu.memory_space<vmem>>, %arg15: memref<32x32xf32, #tpu.memory_space<vmem>>, %arg16: memref<32x32xf32, #tpu.memory_space<vmem>>, %arg17: memref<1x32xf32, #tpu.memory_space<vmem>>, %arg18: memref<1x32xf32, #tpu.memory_space<vmem>>, %arg19: memref<1x32xf32, #tpu.memory_space<vmem>>, %arg20: memref<32x32xf32, #tpu.memory_space<vmem>>, %arg21: memref<1x32xf32, #tpu.memory_space<vmem>>, %arg22: memref<1x32xf32, #tpu.memory_space<vmem>>, %arg23: memref<1x32xf32, #tpu.memory_space<vmem>>, %arg24: memref<1x32xf32, #tpu.memory_space<vmem>>, %arg25: memref<1x32xf32, #tpu.memory_space<vmem>>, %arg26: memref<1x32xf32, #tpu.memory_space<vmem>>, %arg27: memref<1x32xf32, #tpu.memory_space<vmem>>, %arg28: memref<32x128xf32, #tpu.memory_space<vmem>>, %arg29: memref<1x128xf32, #tpu.memory_space<vmem>>, %arg30: memref<128x32xf32, #tpu.memory_space<vmem>>, %arg31: memref<1x32xf32, #tpu.memory_space<vmem>>, %arg32: memref<1x8x32xf32, #tpu.memory_space<vmem>>) attributes {dimension_semantics = [#tpu.dimension_semantics<parallel>], iteration_bounds = array<i64: 2>, scalar_prefetch = 0 : i64, scratch_operands = 0 : i64, tpu.core_type = #tpu.core_type<tc>, window_params = [{transform_indices = @transform_0, window_bounds = array<i64: 1, 8, 32>}, {transform_indices = @transform_1, window_bounds = array<i64: 1, 16, 32>}, {transform_indices = @transform_2, window_bounds = array<i64: 1, 16, 32>}, {pipeline_mode = #tpu.pipeline_mode<synchronous>, transform_indices = @transform_3, window_bounds = array<i64: 8, 8>}, {pipeline_mode = #tpu.pipeline_mode<synchronous>, transform_indices = @transform_4, window_bounds = array<i64: 8, 16>}, {pipeline_mode = #tpu.pipeline_mode<synchronous>, transform_indices = @transform_5, window_bounds = array<i64: 32, 32>}, {pipeline_mode = #tpu.pipeline_mode<synchronous>, transform_indices = @transform_6, window_bounds = array<i64: 32, 32>}, {pipeline_mode = #tpu.pipeline_mode<synchronous>, transform_indices = @transform_7, window_bounds = array<i64: 32, 32>}, {pipeline_mode = #tpu.pipeline_mode<synchronous>, transform_indices = @transform_8, window_bounds = array<i64: 1, 32>}, {pipeline_mode = #tpu.pipeline_mode<synchronous>, transform_indices = @transform_9, window_bounds = array<i64: 1, 32>}, {pipeline_mode = #tpu.pipeline_mode<synchronous>, transform_indices = @transform_10, window_bounds = array<i64: 1, 32>}, {pipeline_mode = #tpu.pipeline_mode<synchronous>, transform_indices = @transform_11, window_bounds = array<i64: 32, 32>}, {pipeline_mode = #tpu.pipeline_mode<synchronous>, transform_indices = @transform_12, window_bounds = array<i64: 1, 32>}, {pipeline_mode = #tpu.pipeline_mode<synchronous>, transform_indices = @transform_13, window_bounds = array<i64: 32, 32>}, {pipeline_mode = #tpu.pipeline_mode<synchronous>, transform_indices = @transform_14, window_bounds = array<i64: 32, 32>}, {pipeline_mode = #tpu.pipeline_mode<synchronous>, transform_indices = @transform_15, window_bounds = array<i64: 32, 32>}, {pipeline_mode = #tpu.pipeline_mode<synchronous>, transform_indices = @transform_16, window_bounds = array<i64: 1, 32>}, {pipeline_mode = #tpu.pipeline_mode<synchronous>, transform_indices = @transform_17, window_bounds = array<i64: 1, 32>}, {pipeline_mode = #tpu.pipeline_mode<synchronous>, transform_indices = @transform_18, window_bounds = array<i64: 1, 32>}, {pipeline_mode = #tpu.pipeline_mode<synchronous>, transform_indices = @transform_19, window_bounds = array<i64: 32, 32>}, {pipeline_mode = #tpu.pipeline_mode<synchronous>, transform_indices = @transform_20, window_bounds = array<i64: 1, 32>}, {pipeline_mode = #tpu.pipeline_mode<synchronous>, transform_indices = @transform_21, window_bounds = array<i64: 1, 32>}, {pipeline_mode = #tpu.pipeline_mode<synchronous>, transform_indices = @transform_22, window_bounds = array<i64: 1, 32>}, {pipeline_mode = #tpu.pipeline_mode<synchronous>, transform_indices = @transform_23, window_bounds = array<i64: 1, 32>}, {pipeline_mode = #tpu.pipeline_mode<synchronous>, transform_indices = @transform_24, window_bounds = array<i64: 1, 32>}, {pipeline_mode = #tpu.pipeline_mode<synchronous>, transform_indices = @transform_25, window_bounds = array<i64: 1, 32>}, {pipeline_mode = #tpu.pipeline_mode<synchronous>, transform_indices = @transform_26, window_bounds = array<i64: 1, 32>}, {pipeline_mode = #tpu.pipeline_mode<synchronous>, transform_indices = @transform_27, window_bounds = array<i64: 32, 128>}, {pipeline_mode = #tpu.pipeline_mode<synchronous>, transform_indices = @transform_28, window_bounds = array<i64: 1, 128>}, {pipeline_mode = #tpu.pipeline_mode<synchronous>, transform_indices = @transform_29, window_bounds = array<i64: 128, 32>}, {pipeline_mode = #tpu.pipeline_mode<synchronous>, transform_indices = @transform_30, window_bounds = array<i64: 1, 32>}, {transform_indices = @transform_31, window_bounds = array<i64: 1, 8, 32>}]} {
    %c0 = arith.constant 0 : index
    %c0_0 = arith.constant 0 : index
    %c0_1 = arith.constant 0 : index
    %0 = vector.load %arg1[%c0, %c0_0, %c0_1] : memref<1x8x32xf32, #tpu.memory_space<vmem>>, vector<1x8x32xf32>
    %1 = vector.shape_cast %0 : vector<1x8x32xf32> to vector<8x32xf32>
    %c0_2 = arith.constant 0 : index
    %c0_3 = arith.constant 0 : index
    %c0_4 = arith.constant 0 : index
    %2 = vector.load %arg3[%c0_2, %c0_3, %c0_4] : memref<1x16x32xf32, #tpu.memory_space<vmem>>, vector<1x16x32xf32>
    %3 = vector.shape_cast %2 : vector<1x16x32xf32> to vector<16x32xf32>
    %c0_5 = arith.constant 0 : index
    %c0_6 = arith.constant 0 : index
    %c0_7 = arith.constant 0 : index
    %4 = vector.load %arg2[%c0_5, %c0_6, %c0_7] : memref<1x16x32xf32, #tpu.memory_space<vmem>>, vector<1x16x32xf32>
    %5 = vector.shape_cast %4 : vector<1x16x32xf32> to vector<16x32xf32>
    %c0_8 = arith.constant 0 : index
    %c0_9 = arith.constant 0 : index
    %6 = vector.load %arg4[%c0_8, %c0_9] : memref<8x8xf32, #tpu.memory_space<vmem>>, vector<8x8xf32>
    %c0_10 = arith.constant 0 : index
    %c0_11 = arith.constant 0 : index
    %7 = vector.load %arg6[%c0_10, %c0_11] : memref<32x32xf32, #tpu.memory_space<vmem>>, vector<32x32xf32>
    %cst = arith.constant dense<0.000000e+00> : vector<8x32xf32>
    %8 = tpu.matmul %1, %7, %cst {dimension_numbers = #tpu.dot_dimension_numbers<[1], [0], [0], [1], [0, 0, 1, 1], [], []>} : vector<8x32xf32>, vector<32x32xf32>, vector<8x32xf32> -> vector<8x32xf32>
    %c0_12 = arith.constant 0 : index
    %c0_13 = arith.constant 0 : index
    %9 = vector.load %arg9[%c0_12, %c0_13] : memref<1x32xf32, #tpu.memory_space<vmem>>, vector<1x32xf32>
    %10 = vector.broadcast %9 : vector<1x32xf32> to vector<8x32xf32>
    %11 = arith.addf %8, %10 : vector<8x32xf32>
    %cst_14 = arith.constant 0.353553385 : f32
    %12 = vector.broadcast %cst_14 : f32 to vector<8x32xf32>
    %13 = arith.mulf %11, %12 : vector<8x32xf32>
    %c0_15 = arith.constant 0 : index
    %c0_16 = arith.constant 0 : index
    %14 = vector.load %arg7[%c0_15, %c0_16] : memref<32x32xf32, #tpu.memory_space<vmem>>, vector<32x32xf32>
    %cst_17 = arith.constant dense<0.000000e+00> : vector<8x32xf32>
    %15 = tpu.matmul %1, %14, %cst_17 {dimension_numbers = #tpu.dot_dimension_numbers<[1], [0], [0], [1], [0, 0, 1, 1], [], []>} : vector<8x32xf32>, vector<32x32xf32>, vector<8x32xf32> -> vector<8x32xf32>
    %c0_18 = arith.constant 0 : index
    %c0_19 = arith.constant 0 : index
    %16 = vector.load %arg10[%c0_18, %c0_19] : memref<1x32xf32, #tpu.memory_space<vmem>>, vector<1x32xf32>
    %17 = vector.broadcast %16 : vector<1x32xf32> to vector<8x32xf32>
    %18 = arith.addf %15, %17 : vector<8x32xf32>
    %c0_20 = arith.constant 0 : index
    %c0_21 = arith.constant 0 : index
    %19 = vector.load %arg8[%c0_20, %c0_21] : memref<32x32xf32, #tpu.memory_space<vmem>>, vector<32x32xf32>
    %cst_22 = arith.constant dense<0.000000e+00> : vector<8x32xf32>
    %20 = tpu.matmul %1, %19, %cst_22 {dimension_numbers = #tpu.dot_dimension_numbers<[1], [0], [0], [1], [0, 0, 1, 1], [], []>} : vector<8x32xf32>, vector<32x32xf32>, vector<8x32xf32> -> vector<8x32xf32>
    %c0_23 = arith.constant 0 : index
    %c0_24 = arith.constant 0 : index
    %21 = vector.load %arg11[%c0_23, %c0_24] : memref<1x32xf32, #tpu.memory_space<vmem>>, vector<1x32xf32>
    %22 = vector.broadcast %21 : vector<1x32xf32> to vector<8x32xf32>
    %23 = arith.addf %20, %22 : vector<8x32xf32>
    %c0_25 = arith.constant 0 : index
    %c0_26 = arith.constant 0 : index
    %24 = vector.load %arg12[%c0_25, %c0_26] : memref<32x32xf32, #tpu.memory_space<vmem>>, vector<32x32xf32>
    %25 = vector.extract_strided_slice %13 {offsets = [0, 0], sizes = [8, 8], strides = [1, 1]} : vector<8x32xf32> to vector<8x8xf32>
    %26 = vector.extract_strided_slice %18 {offsets = [0, 0], sizes = [8, 8], strides = [1, 1]} : vector<8x32xf32> to vector<8x8xf32>
    %27 = vector.extract_strided_slice %23 {offsets = [0, 0], sizes = [8, 8], strides = [1, 1]} : vector<8x32xf32> to vector<8x8xf32>
    "tpu.trace_start"() <{level = 10 : i32, message = "ld,sd->ls"}> : () -> ()
    %cst_27 = arith.constant dense<0.000000e+00> : vector<8x8xf32>
    %28 = tpu.matmul %25, %26, %cst_27 {dimension_numbers = #tpu.dot_dimension_numbers<[1], [1], [0], [0], [0, 0, 1, 0], [], []>} : vector<8x8xf32>, vector<8x8xf32>, vector<8x8xf32> -> vector<8x8xf32>
    "tpu.trace_stop"() : () -> ()
    %29 = arith.addf %28, %6 : vector<8x8xf32>
    %cst_28 = arith.constant dense<0xFF800000> : vector<8xf32>
    %30 = vector.multi_reduction <maximumf>, %29, %cst_28 [1] : vector<8x8xf32> to vector<8xf32>
    %31 = vector.shape_cast %30 : vector<8xf32> to vector<8x1xf32>
    %32 = vector.broadcast %31 : vector<8x1xf32> to vector<8x8xf32>
    %33 = arith.subf %29, %32 : vector<8x8xf32>
    %34 = math.exp %33 : vector<8x8xf32>
    %cst_29 = arith.constant dense<0.000000e+00> : vector<8xf32>
    %35 = vector.multi_reduction <add>, %34, %cst_29 [1] : vector<8x8xf32> to vector<8xf32>
    %36 = vector.shape_cast %35 : vector<8xf32> to vector<8x1xf32>
    %37 = tpu.reciprocal %36 {approx = true} : vector<8x1xf32> -> vector<8x1xf32>
    %38 = vector.broadcast %37 : vector<8x1xf32> to vector<8x8xf32>
    %39 = arith.mulf %34, %38 : vector<8x8xf32>
    "tpu.trace_start"() <{level = 10 : i32, message = "ls,sd->ld"}> : () -> ()
    %cst_30 = arith.constant dense<0.000000e+00> : vector<8x8xf32>
    %40 = tpu.matmul %39, %27, %cst_30 {dimension_numbers = #tpu.dot_dimension_numbers<[1], [0], [0], [1], [0, 0, 1, 1], [], []>} : vector<8x8xf32>, vector<8x8xf32>, vector<8x8xf32> -> vector<8x8xf32>
    "tpu.trace_stop"() : () -> ()
    %41 = vector.extract_strided_slice %24 {offsets = [0, 0], sizes = [8, 32], strides = [1, 1]} : vector<32x32xf32> to vector<8x32xf32>
    %cst_31 = arith.constant dense<0.000000e+00> : vector<8x32xf32>
    %42 = tpu.matmul %40, %41, %cst_31 {dimension_numbers = #tpu.dot_dimension_numbers<[1], [0], [0], [1], [0, 0, 1, 1], [], []>} : vector<8x8xf32>, vector<8x32xf32>, vector<8x32xf32> -> vector<8x32xf32>
    %43 = vector.extract_strided_slice %13 {offsets = [0, 8], sizes = [8, 8], strides = [1, 1]} : vector<8x32xf32> to vector<8x8xf32>
    %44 = vector.extract_strided_slice %18 {offsets = [0, 8], sizes = [8, 8], strides = [1, 1]} : vector<8x32xf32> to vector<8x8xf32>
    %45 = vector.extract_strided_slice %23 {offsets = [0, 8], sizes = [8, 8], strides = [1, 1]} : vector<8x32xf32> to vector<8x8xf32>
    "tpu.trace_start"() <{level = 10 : i32, message = "ld,sd->ls"}> : () -> ()
    %cst_32 = arith.constant dense<0.000000e+00> : vector<8x8xf32>
    %46 = tpu.matmul %43, %44, %cst_32 {dimension_numbers = #tpu.dot_dimension_numbers<[1], [1], [0], [0], [0, 0, 1, 0], [], []>} : vector<8x8xf32>, vector<8x8xf32>, vector<8x8xf32> -> vector<8x8xf32>
    "tpu.trace_stop"() : () -> ()
    %47 = arith.addf %46, %6 : vector<8x8xf32>
    %cst_33 = arith.constant dense<0xFF800000> : vector<8xf32>
    %48 = vector.multi_reduction <maximumf>, %47, %cst_33 [1] : vector<8x8xf32> to vector<8xf32>
    %49 = vector.shape_cast %48 : vector<8xf32> to vector<8x1xf32>
    %50 = vector.broadcast %49 : vector<8x1xf32> to vector<8x8xf32>
    %51 = arith.subf %47, %50 : vector<8x8xf32>
    %52 = math.exp %51 : vector<8x8xf32>
    %cst_34 = arith.constant dense<0.000000e+00> : vector<8xf32>
    %53 = vector.multi_reduction <add>, %52, %cst_34 [1] : vector<8x8xf32> to vector<8xf32>
    %54 = vector.shape_cast %53 : vector<8xf32> to vector<8x1xf32>
    %55 = tpu.reciprocal %54 {approx = true} : vector<8x1xf32> -> vector<8x1xf32>
    %56 = vector.broadcast %55 : vector<8x1xf32> to vector<8x8xf32>
    %57 = arith.mulf %52, %56 : vector<8x8xf32>
    "tpu.trace_start"() <{level = 10 : i32, message = "ls,sd->ld"}> : () -> ()
    %cst_35 = arith.constant dense<0.000000e+00> : vector<8x8xf32>
    %58 = tpu.matmul %57, %45, %cst_35 {dimension_numbers = #tpu.dot_dimension_numbers<[1], [0], [0], [1], [0, 0, 1, 1], [], []>} : vector<8x8xf32>, vector<8x8xf32>, vector<8x8xf32> -> vector<8x8xf32>
    "tpu.trace_stop"() : () -> ()
    %59 = vector.extract_strided_slice %24 {offsets = [8, 0], sizes = [8, 32], strides = [1, 1]} : vector<32x32xf32> to vector<8x32xf32>
    %cst_36 = arith.constant dense<0.000000e+00> : vector<8x32xf32>
    %60 = tpu.matmul %58, %59, %cst_36 {dimension_numbers = #tpu.dot_dimension_numbers<[1], [0], [0], [1], [0, 0, 1, 1], [], []>} : vector<8x8xf32>, vector<8x32xf32>, vector<8x32xf32> -> vector<8x32xf32>
    %61 = arith.addf %42, %60 : vector<8x32xf32>
    %62 = vector.extract_strided_slice %13 {offsets = [0, 16], sizes = [8, 8], strides = [1, 1]} : vector<8x32xf32> to vector<8x8xf32>
    %63 = vector.extract_strided_slice %18 {offsets = [0, 16], sizes = [8, 8], strides = [1, 1]} : vector<8x32xf32> to vector<8x8xf32>
    %64 = vector.extract_strided_slice %23 {offsets = [0, 16], sizes = [8, 8], strides = [1, 1]} : vector<8x32xf32> to vector<8x8xf32>
    "tpu.trace_start"() <{level = 10 : i32, message = "ld,sd->ls"}> : () -> ()
    %cst_37 = arith.constant dense<0.000000e+00> : vector<8x8xf32>
    %65 = tpu.matmul %62, %63, %cst_37 {dimension_numbers = #tpu.dot_dimension_numbers<[1], [1], [0], [0], [0, 0, 1, 0], [], []>} : vector<8x8xf32>, vector<8x8xf32>, vector<8x8xf32> -> vector<8x8xf32>
    "tpu.trace_stop"() : () -> ()
    %66 = arith.addf %65, %6 : vector<8x8xf32>
    %cst_38 = arith.constant dense<0xFF800000> : vector<8xf32>
    %67 = vector.multi_reduction <maximumf>, %66, %cst_38 [1] : vector<8x8xf32> to vector<8xf32>
    %68 = vector.shape_cast %67 : vector<8xf32> to vector<8x1xf32>
    %69 = vector.broadcast %68 : vector<8x1xf32> to vector<8x8xf32>
    %70 = arith.subf %66, %69 : vector<8x8xf32>
    %71 = math.exp %70 : vector<8x8xf32>
    %cst_39 = arith.constant dense<0.000000e+00> : vector<8xf32>
    %72 = vector.multi_reduction <add>, %71, %cst_39 [1] : vector<8x8xf32> to vector<8xf32>
    %73 = vector.shape_cast %72 : vector<8xf32> to vector<8x1xf32>
    %74 = tpu.reciprocal %73 {approx = true} : vector<8x1xf32> -> vector<8x1xf32>
    %75 = vector.broadcast %74 : vector<8x1xf32> to vector<8x8xf32>
    %76 = arith.mulf %71, %75 : vector<8x8xf32>
    "tpu.trace_start"() <{level = 10 : i32, message = "ls,sd->ld"}> : () -> ()
    %cst_40 = arith.constant dense<0.000000e+00> : vector<8x8xf32>
    %77 = tpu.matmul %76, %64, %cst_40 {dimension_numbers = #tpu.dot_dimension_numbers<[1], [0], [0], [1], [0, 0, 1, 1], [], []>} : vector<8x8xf32>, vector<8x8xf32>, vector<8x8xf32> -> vector<8x8xf32>
    "tpu.trace_stop"() : () -> ()
    %78 = vector.extract_strided_slice %24 {offsets = [16, 0], sizes = [8, 32], strides = [1, 1]} : vector<32x32xf32> to vector<8x32xf32>
    %cst_41 = arith.constant dense<0.000000e+00> : vector<8x32xf32>
    %79 = tpu.matmul %77, %78, %cst_41 {dimension_numbers = #tpu.dot_dimension_numbers<[1], [0], [0], [1], [0, 0, 1, 1], [], []>} : vector<8x8xf32>, vector<8x32xf32>, vector<8x32xf32> -> vector<8x32xf32>
    %80 = arith.addf %61, %79 : vector<8x32xf32>
    %81 = vector.extract_strided_slice %13 {offsets = [0, 24], sizes = [8, 8], strides = [1, 1]} : vector<8x32xf32> to vector<8x8xf32>
    %82 = vector.extract_strided_slice %18 {offsets = [0, 24], sizes = [8, 8], strides = [1, 1]} : vector<8x32xf32> to vector<8x8xf32>
    %83 = vector.extract_strided_slice %23 {offsets = [0, 24], sizes = [8, 8], strides = [1, 1]} : vector<8x32xf32> to vector<8x8xf32>
    "tpu.trace_start"() <{level = 10 : i32, message = "ld,sd->ls"}> : () -> ()
    %cst_42 = arith.constant dense<0.000000e+00> : vector<8x8xf32>
    %84 = tpu.matmul %81, %82, %cst_42 {dimension_numbers = #tpu.dot_dimension_numbers<[1], [1], [0], [0], [0, 0, 1, 0], [], []>} : vector<8x8xf32>, vector<8x8xf32>, vector<8x8xf32> -> vector<8x8xf32>
    "tpu.trace_stop"() : () -> ()
    %85 = arith.addf %84, %6 : vector<8x8xf32>
    %cst_43 = arith.constant dense<0xFF800000> : vector<8xf32>
    %86 = vector.multi_reduction <maximumf>, %85, %cst_43 [1] : vector<8x8xf32> to vector<8xf32>
    %87 = vector.shape_cast %86 : vector<8xf32> to vector<8x1xf32>
    %88 = vector.broadcast %87 : vector<8x1xf32> to vector<8x8xf32>
    %89 = arith.subf %85, %88 : vector<8x8xf32>
    %90 = math.exp %89 : vector<8x8xf32>
    %cst_44 = arith.constant dense<0.000000e+00> : vector<8xf32>
    %91 = vector.multi_reduction <add>, %90, %cst_44 [1] : vector<8x8xf32> to vector<8xf32>
    %92 = vector.shape_cast %91 : vector<8xf32> to vector<8x1xf32>
    %93 = tpu.reciprocal %92 {approx = true} : vector<8x1xf32> -> vector<8x1xf32>
    %94 = vector.broadcast %93 : vector<8x1xf32> to vector<8x8xf32>
    %95 = arith.mulf %90, %94 : vector<8x8xf32>
    "tpu.trace_start"() <{level = 10 : i32, message = "ls,sd->ld"}> : () -> ()
    %cst_45 = arith.constant dense<0.000000e+00> : vector<8x8xf32>
    %96 = tpu.matmul %95, %83, %cst_45 {dimension_numbers = #tpu.dot_dimension_numbers<[1], [0], [0], [1], [0, 0, 1, 1], [], []>} : vector<8x8xf32>, vector<8x8xf32>, vector<8x8xf32> -> vector<8x8xf32>
    "tpu.trace_stop"() : () -> ()
    %97 = vector.extract_strided_slice %24 {offsets = [24, 0], sizes = [8, 32], strides = [1, 1]} : vector<32x32xf32> to vector<8x32xf32>
    %cst_46 = arith.constant dense<0.000000e+00> : vector<8x32xf32>
    %98 = tpu.matmul %96, %97, %cst_46 {dimension_numbers = #tpu.dot_dimension_numbers<[1], [0], [0], [1], [0, 0, 1, 1], [], []>} : vector<8x8xf32>, vector<8x32xf32>, vector<8x32xf32> -> vector<8x32xf32>
    %99 = arith.addf %80, %98 : vector<8x32xf32>
    %c0_47 = arith.constant 0 : index
    %c0_48 = arith.constant 0 : index
    %100 = vector.load %arg13[%c0_47, %c0_48] : memref<1x32xf32, #tpu.memory_space<vmem>>, vector<1x32xf32>
    %101 = vector.broadcast %100 : vector<1x32xf32> to vector<8x32xf32>
    %102 = arith.addf %99, %101 : vector<8x32xf32>
    %103 = arith.addf %102, %1 : vector<8x32xf32>
    %cst_49 = arith.constant dense<0.000000e+00> : vector<8xf32>
    %104 = vector.multi_reduction <add>, %103, %cst_49 [1] : vector<8x32xf32> to vector<8xf32>
    %105 = vector.shape_cast %104 : vector<8xf32> to vector<8x1xf32>
    %cst_50 = arith.constant 3.200000e+01 : f32
    %106 = vector.broadcast %cst_50 : f32 to vector<8x1xf32>
    %107 = arith.divf %105, %106 : vector<8x1xf32>
    %108 = vector.broadcast %107 : vector<8x1xf32> to vector<8x32xf32>
    %109 = arith.subf %103, %108 : vector<8x32xf32>
    %110 = vector.broadcast %107 : vector<8x1xf32> to vector<8x32xf32>
    %111 = arith.subf %103, %110 : vector<8x32xf32>
    %112 = arith.mulf %109, %111 : vector<8x32xf32>
    %cst_51 = arith.constant dense<0.000000e+00> : vector<8xf32>
    %113 = vector.multi_reduction <add>, %112, %cst_51 [1] : vector<8x32xf32> to vector<8xf32>
    %114 = vector.shape_cast %113 : vector<8xf32> to vector<8x1xf32>
    %cst_52 = arith.constant 3.200000e+01 : f32
    %115 = vector.broadcast %cst_52 : f32 to vector<8x1xf32>
    %116 = arith.divf %114, %115 : vector<8x1xf32>
    %117 = vector.broadcast %107 : vector<8x1xf32> to vector<8x32xf32>
    %118 = arith.subf %103, %117 : vector<8x32xf32>
    %cst_53 = arith.constant 9.99999974E-6 : f32
    %119 = vector.broadcast %cst_53 : f32 to vector<8x1xf32>
    %120 = arith.addf %116, %119 : vector<8x1xf32>
    %121 = math.rsqrt %120 : vector<8x1xf32>
    %122 = vector.broadcast %121 : vector<8x1xf32> to vector<8x32xf32>
    %123 = arith.mulf %118, %122 : vector<8x32xf32>
    %c0_54 = arith.constant 0 : index
    %c0_55 = arith.constant 0 : index
    %124 = vector.load %arg22[%c0_54, %c0_55] : memref<1x32xf32, #tpu.memory_space<vmem>>, vector<1x32xf32>
    %125 = vector.broadcast %124 : vector<1x32xf32> to vector<8x32xf32>
    %126 = arith.mulf %123, %125 : vector<8x32xf32>
    %c0_56 = arith.constant 0 : index
    %c0_57 = arith.constant 0 : index
    %127 = vector.load %arg23[%c0_56, %c0_57] : memref<1x32xf32, #tpu.memory_space<vmem>>, vector<1x32xf32>
    %128 = vector.broadcast %127 : vector<1x32xf32> to vector<8x32xf32>
    %129 = arith.addf %126, %128 : vector<8x32xf32>
    %c0_58 = arith.constant 0 : index
    %c0_59 = arith.constant 0 : index
    %130 = vector.load %arg5[%c0_58, %c0_59] : memref<8x16xf32, #tpu.memory_space<vmem>>, vector<8x16xf32>
    %c0_60 = arith.constant 0 : index
    %c0_61 = arith.constant 0 : index
    %131 = vector.load %arg14[%c0_60, %c0_61] : memref<32x32xf32, #tpu.memory_space<vmem>>, vector<32x32xf32>
    %cst_62 = arith.constant dense<0.000000e+00> : vector<8x32xf32>
    %132 = tpu.matmul %129, %131, %cst_62 {dimension_numbers = #tpu.dot_dimension_numbers<[1], [0], [0], [1], [0, 0, 1, 1], [], []>} : vector<8x32xf32>, vector<32x32xf32>, vector<8x32xf32> -> vector<8x32xf32>
    %c0_63 = arith.constant 0 : index
    %c0_64 = arith.constant 0 : index
    %133 = vector.load %arg17[%c0_63, %c0_64] : memref<1x32xf32, #tpu.memory_space<vmem>>, vector<1x32xf32>
    %134 = vector.broadcast %133 : vector<1x32xf32> to vector<8x32xf32>
    %135 = arith.addf %132, %134 : vector<8x32xf32>
    %cst_65 = arith.constant 0.353553385 : f32
    %136 = vector.broadcast %cst_65 : f32 to vector<8x32xf32>
    %137 = arith.mulf %135, %136 : vector<8x32xf32>
    %c0_66 = arith.constant 0 : index
    %c0_67 = arith.constant 0 : index
    %138 = vector.load %arg15[%c0_66, %c0_67] : memref<32x32xf32, #tpu.memory_space<vmem>>, vector<32x32xf32>
    %cst_68 = arith.constant dense<0.000000e+00> : vector<16x32xf32>
    %139 = tpu.matmul %3, %138, %cst_68 {dimension_numbers = #tpu.dot_dimension_numbers<[1], [0], [0], [1], [0, 0, 1, 1], [], []>} : vector<16x32xf32>, vector<32x32xf32>, vector<16x32xf32> -> vector<16x32xf32>
    %c0_69 = arith.constant 0 : index
    %c0_70 = arith.constant 0 : index
    %140 = vector.load %arg18[%c0_69, %c0_70] : memref<1x32xf32, #tpu.memory_space<vmem>>, vector<1x32xf32>
    %141 = vector.broadcast %140 : vector<1x32xf32> to vector<16x32xf32>
    %142 = arith.addf %139, %141 : vector<16x32xf32>
    %c0_71 = arith.constant 0 : index
    %c0_72 = arith.constant 0 : index
    %143 = vector.load %arg16[%c0_71, %c0_72] : memref<32x32xf32, #tpu.memory_space<vmem>>, vector<32x32xf32>
    %cst_73 = arith.constant dense<0.000000e+00> : vector<16x32xf32>
    %144 = tpu.matmul %5, %143, %cst_73 {dimension_numbers = #tpu.dot_dimension_numbers<[1], [0], [0], [1], [0, 0, 1, 1], [], []>} : vector<16x32xf32>, vector<32x32xf32>, vector<16x32xf32> -> vector<16x32xf32>
    %c0_74 = arith.constant 0 : index
    %c0_75 = arith.constant 0 : index
    %145 = vector.load %arg19[%c0_74, %c0_75] : memref<1x32xf32, #tpu.memory_space<vmem>>, vector<1x32xf32>
    %146 = vector.broadcast %145 : vector<1x32xf32> to vector<16x32xf32>
    %147 = arith.addf %144, %146 : vector<16x32xf32>
    %c0_76 = arith.constant 0 : index
    %c0_77 = arith.constant 0 : index
    %148 = vector.load %arg20[%c0_76, %c0_77] : memref<32x32xf32, #tpu.memory_space<vmem>>, vector<32x32xf32>
    %149 = vector.extract_strided_slice %137 {offsets = [0, 0], sizes = [8, 8], strides = [1, 1]} : vector<8x32xf32> to vector<8x8xf32>
    %150 = vector.extract_strided_slice %142 {offsets = [0, 0], sizes = [16, 8], strides = [1, 1]} : vector<16x32xf32> to vector<16x8xf32>
    %151 = vector.extract_strided_slice %147 {offsets = [0, 0], sizes = [16, 8], strides = [1, 1]} : vector<16x32xf32> to vector<16x8xf32>
    "tpu.trace_start"() <{level = 10 : i32, message = "ld,sd->ls"}> : () -> ()
    %cst_78 = arith.constant dense<0.000000e+00> : vector<8x16xf32>
    %152 = tpu.matmul %149, %150, %cst_78 {dimension_numbers = #tpu.dot_dimension_numbers<[1], [1], [0], [0], [0, 0, 1, 0], [], []>} : vector<8x8xf32>, vector<16x8xf32>, vector<8x16xf32> -> vector<8x16xf32>
    "tpu.trace_stop"() : () -> ()
    %153 = arith.addf %152, %130 : vector<8x16xf32>
    %cst_79 = arith.constant dense<0xFF800000> : vector<8xf32>
    %154 = vector.multi_reduction <maximumf>, %153, %cst_79 [1] : vector<8x16xf32> to vector<8xf32>
    %155 = vector.shape_cast %154 : vector<8xf32> to vector<8x1xf32>
    %156 = vector.broadcast %155 : vector<8x1xf32> to vector<8x16xf32>
    %157 = arith.subf %153, %156 : vector<8x16xf32>
    %158 = math.exp %157 : vector<8x16xf32>
    %cst_80 = arith.constant dense<0.000000e+00> : vector<8xf32>
    %159 = vector.multi_reduction <add>, %158, %cst_80 [1] : vector<8x16xf32> to vector<8xf32>
    %160 = vector.shape_cast %159 : vector<8xf32> to vector<8x1xf32>
    %161 = tpu.reciprocal %160 {approx = true} : vector<8x1xf32> -> vector<8x1xf32>
    %162 = vector.broadcast %161 : vector<8x1xf32> to vector<8x16xf32>
    %163 = arith.mulf %158, %162 : vector<8x16xf32>
    "tpu.trace_start"() <{level = 10 : i32, message = "ls,sd->ld"}> : () -> ()
    %cst_81 = arith.constant dense<0.000000e+00> : vector<8x8xf32>
    %164 = tpu.matmul %163, %151, %cst_81 {dimension_numbers = #tpu.dot_dimension_numbers<[1], [0], [0], [1], [0, 0, 1, 1], [], []>} : vector<8x16xf32>, vector<16x8xf32>, vector<8x8xf32> -> vector<8x8xf32>
    "tpu.trace_stop"() : () -> ()
    %165 = vector.extract_strided_slice %148 {offsets = [0, 0], sizes = [8, 32], strides = [1, 1]} : vector<32x32xf32> to vector<8x32xf32>
    %cst_82 = arith.constant dense<0.000000e+00> : vector<8x32xf32>
    %166 = tpu.matmul %164, %165, %cst_82 {dimension_numbers = #tpu.dot_dimension_numbers<[1], [0], [0], [1], [0, 0, 1, 1], [], []>} : vector<8x8xf32>, vector<8x32xf32>, vector<8x32xf32> -> vector<8x32xf32>
    %167 = vector.extract_strided_slice %137 {offsets = [0, 8], sizes = [8, 8], strides = [1, 1]} : vector<8x32xf32> to vector<8x8xf32>
    %168 = vector.extract_strided_slice %142 {offsets = [0, 8], sizes = [16, 8], strides = [1, 1]} : vector<16x32xf32> to vector<16x8xf32>
    %169 = vector.extract_strided_slice %147 {offsets = [0, 8], sizes = [16, 8], strides = [1, 1]} : vector<16x32xf32> to vector<16x8xf32>
    "tpu.trace_start"() <{level = 10 : i32, message = "ld,sd->ls"}> : () -> ()
    %cst_83 = arith.constant dense<0.000000e+00> : vector<8x16xf32>
    %170 = tpu.matmul %167, %168, %cst_83 {dimension_numbers = #tpu.dot_dimension_numbers<[1], [1], [0], [0], [0, 0, 1, 0], [], []>} : vector<8x8xf32>, vector<16x8xf32>, vector<8x16xf32> -> vector<8x16xf32>
    "tpu.trace_stop"() : () -> ()
    %171 = arith.addf %170, %130 : vector<8x16xf32>
    %cst_84 = arith.constant dense<0xFF800000> : vector<8xf32>
    %172 = vector.multi_reduction <maximumf>, %171, %cst_84 [1] : vector<8x16xf32> to vector<8xf32>
    %173 = vector.shape_cast %172 : vector<8xf32> to vector<8x1xf32>
    %174 = vector.broadcast %173 : vector<8x1xf32> to vector<8x16xf32>
    %175 = arith.subf %171, %174 : vector<8x16xf32>
    %176 = math.exp %175 : vector<8x16xf32>
    %cst_85 = arith.constant dense<0.000000e+00> : vector<8xf32>
    %177 = vector.multi_reduction <add>, %176, %cst_85 [1] : vector<8x16xf32> to vector<8xf32>
    %178 = vector.shape_cast %177 : vector<8xf32> to vector<8x1xf32>
    %179 = tpu.reciprocal %178 {approx = true} : vector<8x1xf32> -> vector<8x1xf32>
    %180 = vector.broadcast %179 : vector<8x1xf32> to vector<8x16xf32>
    %181 = arith.mulf %176, %180 : vector<8x16xf32>
    "tpu.trace_start"() <{level = 10 : i32, message = "ls,sd->ld"}> : () -> ()
    %cst_86 = arith.constant dense<0.000000e+00> : vector<8x8xf32>
    %182 = tpu.matmul %181, %169, %cst_86 {dimension_numbers = #tpu.dot_dimension_numbers<[1], [0], [0], [1], [0, 0, 1, 1], [], []>} : vector<8x16xf32>, vector<16x8xf32>, vector<8x8xf32> -> vector<8x8xf32>
    "tpu.trace_stop"() : () -> ()
    %183 = vector.extract_strided_slice %148 {offsets = [8, 0], sizes = [8, 32], strides = [1, 1]} : vector<32x32xf32> to vector<8x32xf32>
    %cst_87 = arith.constant dense<0.000000e+00> : vector<8x32xf32>
    %184 = tpu.matmul %182, %183, %cst_87 {dimension_numbers = #tpu.dot_dimension_numbers<[1], [0], [0], [1], [0, 0, 1, 1], [], []>} : vector<8x8xf32>, vector<8x32xf32>, vector<8x32xf32> -> vector<8x32xf32>
    %185 = arith.addf %166, %184 : vector<8x32xf32>
    %186 = vector.extract_strided_slice %137 {offsets = [0, 16], sizes = [8, 8], strides = [1, 1]} : vector<8x32xf32> to vector<8x8xf32>
    %187 = vector.extract_strided_slice %142 {offsets = [0, 16], sizes = [16, 8], strides = [1, 1]} : vector<16x32xf32> to vector<16x8xf32>
    %188 = vector.extract_strided_slice %147 {offsets = [0, 16], sizes = [16, 8], strides = [1, 1]} : vector<16x32xf32> to vector<16x8xf32>
    "tpu.trace_start"() <{level = 10 : i32, message = "ld,sd->ls"}> : () -> ()
    %cst_88 = arith.constant dense<0.000000e+00> : vector<8x16xf32>
    %189 = tpu.matmul %186, %187, %cst_88 {dimension_numbers = #tpu.dot_dimension_numbers<[1], [1], [0], [0], [0, 0, 1, 0], [], []>} : vector<8x8xf32>, vector<16x8xf32>, vector<8x16xf32> -> vector<8x16xf32>
    "tpu.trace_stop"() : () -> ()
    %190 = arith.addf %189, %130 : vector<8x16xf32>
    %cst_89 = arith.constant dense<0xFF800000> : vector<8xf32>
    %191 = vector.multi_reduction <maximumf>, %190, %cst_89 [1] : vector<8x16xf32> to vector<8xf32>
    %192 = vector.shape_cast %191 : vector<8xf32> to vector<8x1xf32>
    %193 = vector.broadcast %192 : vector<8x1xf32> to vector<8x16xf32>
    %194 = arith.subf %190, %193 : vector<8x16xf32>
    %195 = math.exp %194 : vector<8x16xf32>
    %cst_90 = arith.constant dense<0.000000e+00> : vector<8xf32>
    %196 = vector.multi_reduction <add>, %195, %cst_90 [1] : vector<8x16xf32> to vector<8xf32>
    %197 = vector.shape_cast %196 : vector<8xf32> to vector<8x1xf32>
    %198 = tpu.reciprocal %197 {approx = true} : vector<8x1xf32> -> vector<8x1xf32>
    %199 = vector.broadcast %198 : vector<8x1xf32> to vector<8x16xf32>
    %200 = arith.mulf %195, %199 : vector<8x16xf32>
    "tpu.trace_start"() <{level = 10 : i32, message = "ls,sd->ld"}> : () -> ()
    %cst_91 = arith.constant dense<0.000000e+00> : vector<8x8xf32>
    %201 = tpu.matmul %200, %188, %cst_91 {dimension_numbers = #tpu.dot_dimension_numbers<[1], [0], [0], [1], [0, 0, 1, 1], [], []>} : vector<8x16xf32>, vector<16x8xf32>, vector<8x8xf32> -> vector<8x8xf32>
    "tpu.trace_stop"() : () -> ()
    %202 = vector.extract_strided_slice %148 {offsets = [16, 0], sizes = [8, 32], strides = [1, 1]} : vector<32x32xf32> to vector<8x32xf32>
    %cst_92 = arith.constant dense<0.000000e+00> : vector<8x32xf32>
    %203 = tpu.matmul %201, %202, %cst_92 {dimension_numbers = #tpu.dot_dimension_numbers<[1], [0], [0], [1], [0, 0, 1, 1], [], []>} : vector<8x8xf32>, vector<8x32xf32>, vector<8x32xf32> -> vector<8x32xf32>
    %204 = arith.addf %185, %203 : vector<8x32xf32>
    %205 = vector.extract_strided_slice %137 {offsets = [0, 24], sizes = [8, 8], strides = [1, 1]} : vector<8x32xf32> to vector<8x8xf32>
    %206 = vector.extract_strided_slice %142 {offsets = [0, 24], sizes = [16, 8], strides = [1, 1]} : vector<16x32xf32> to vector<16x8xf32>
    %207 = vector.extract_strided_slice %147 {offsets = [0, 24], sizes = [16, 8], strides = [1, 1]} : vector<16x32xf32> to vector<16x8xf32>
    "tpu.trace_start"() <{level = 10 : i32, message = "ld,sd->ls"}> : () -> ()
    %cst_93 = arith.constant dense<0.000000e+00> : vector<8x16xf32>
    %208 = tpu.matmul %205, %206, %cst_93 {dimension_numbers = #tpu.dot_dimension_numbers<[1], [1], [0], [0], [0, 0, 1, 0], [], []>} : vector<8x8xf32>, vector<16x8xf32>, vector<8x16xf32> -> vector<8x16xf32>
    "tpu.trace_stop"() : () -> ()
    %209 = arith.addf %208, %130 : vector<8x16xf32>
    %cst_94 = arith.constant dense<0xFF800000> : vector<8xf32>
    %210 = vector.multi_reduction <maximumf>, %209, %cst_94 [1] : vector<8x16xf32> to vector<8xf32>
    %211 = vector.shape_cast %210 : vector<8xf32> to vector<8x1xf32>
    %212 = vector.broadcast %211 : vector<8x1xf32> to vector<8x16xf32>
    %213 = arith.subf %209, %212 : vector<8x16xf32>
    %214 = math.exp %213 : vector<8x16xf32>
    %cst_95 = arith.constant dense<0.000000e+00> : vector<8xf32>
    %215 = vector.multi_reduction <add>, %214, %cst_95 [1] : vector<8x16xf32> to vector<8xf32>
    %216 = vector.shape_cast %215 : vector<8xf32> to vector<8x1xf32>
    %217 = tpu.reciprocal %216 {approx = true} : vector<8x1xf32> -> vector<8x1xf32>
    %218 = vector.broadcast %217 : vector<8x1xf32> to vector<8x16xf32>
    %219 = arith.mulf %214, %218 : vector<8x16xf32>
    "tpu.trace_start"() <{level = 10 : i32, message = "ls,sd->ld"}> : () -> ()
    %cst_96 = arith.constant dense<0.000000e+00> : vector<8x8xf32>
    %220 = tpu.matmul %219, %207, %cst_96 {dimension_numbers = #tpu.dot_dimension_numbers<[1], [0], [0], [1], [0, 0, 1, 1], [], []>} : vector<8x16xf32>, vector<16x8xf32>, vector<8x8xf32> -> vector<8x8xf32>
    "tpu.trace_stop"() : () -> ()
    %221 = vector.extract_strided_slice %148 {offsets = [24, 0], sizes = [8, 32], strides = [1, 1]} : vector<32x32xf32> to vector<8x32xf32>
    %cst_97 = arith.constant dense<0.000000e+00> : vector<8x32xf32>
    %222 = tpu.matmul %220, %221, %cst_97 {dimension_numbers = #tpu.dot_dimension_numbers<[1], [0], [0], [1], [0, 0, 1, 1], [], []>} : vector<8x8xf32>, vector<8x32xf32>, vector<8x32xf32> -> vector<8x32xf32>
    %223 = arith.addf %204, %222 : vector<8x32xf32>
    %c0_98 = arith.constant 0 : index
    %c0_99 = arith.constant 0 : index
    %224 = vector.load %arg21[%c0_98, %c0_99] : memref<1x32xf32, #tpu.memory_space<vmem>>, vector<1x32xf32>
    %225 = vector.broadcast %224 : vector<1x32xf32> to vector<8x32xf32>
    %226 = arith.addf %223, %225 : vector<8x32xf32>
    %227 = arith.addf %226, %129 : vector<8x32xf32>
    %cst_100 = arith.constant dense<0.000000e+00> : vector<8xf32>
    %228 = vector.multi_reduction <add>, %227, %cst_100 [1] : vector<8x32xf32> to vector<8xf32>
    %229 = vector.shape_cast %228 : vector<8xf32> to vector<8x1xf32>
    %cst_101 = arith.constant 3.200000e+01 : f32
    %230 = vector.broadcast %cst_101 : f32 to vector<8x1xf32>
    %231 = arith.divf %229, %230 : vector<8x1xf32>
    %232 = vector.broadcast %231 : vector<8x1xf32> to vector<8x32xf32>
    %233 = arith.subf %227, %232 : vector<8x32xf32>
    %234 = vector.broadcast %231 : vector<8x1xf32> to vector<8x32xf32>
    %235 = arith.subf %227, %234 : vector<8x32xf32>
    %236 = arith.mulf %233, %235 : vector<8x32xf32>
    %cst_102 = arith.constant dense<0.000000e+00> : vector<8xf32>
    %237 = vector.multi_reduction <add>, %236, %cst_102 [1] : vector<8x32xf32> to vector<8xf32>
    %238 = vector.shape_cast %237 : vector<8xf32> to vector<8x1xf32>
    %cst_103 = arith.constant 3.200000e+01 : f32
    %239 = vector.broadcast %cst_103 : f32 to vector<8x1xf32>
    %240 = arith.divf %238, %239 : vector<8x1xf32>
    %241 = vector.broadcast %231 : vector<8x1xf32> to vector<8x32xf32>
    %242 = arith.subf %227, %241 : vector<8x32xf32>
    %cst_104 = arith.constant 9.99999974E-6 : f32
    %243 = vector.broadcast %cst_104 : f32 to vector<8x1xf32>
    %244 = arith.addf %240, %243 : vector<8x1xf32>
    %245 = math.rsqrt %244 : vector<8x1xf32>
    %246 = vector.broadcast %245 : vector<8x1xf32> to vector<8x32xf32>
    %247 = arith.mulf %242, %246 : vector<8x32xf32>
    %c0_105 = arith.constant 0 : index
    %c0_106 = arith.constant 0 : index
    %248 = vector.load %arg24[%c0_105, %c0_106] : memref<1x32xf32, #tpu.memory_space<vmem>>, vector<1x32xf32>
    %249 = vector.broadcast %248 : vector<1x32xf32> to vector<8x32xf32>
    %250 = arith.mulf %247, %249 : vector<8x32xf32>
    %c0_107 = arith.constant 0 : index
    %c0_108 = arith.constant 0 : index
    %251 = vector.load %arg25[%c0_107, %c0_108] : memref<1x32xf32, #tpu.memory_space<vmem>>, vector<1x32xf32>
    %252 = vector.broadcast %251 : vector<1x32xf32> to vector<8x32xf32>
    %253 = arith.addf %250, %252 : vector<8x32xf32>
    %c0_109 = arith.constant 0 : index
    %c0_110 = arith.constant 0 : index
    %254 = vector.load %arg28[%c0_109, %c0_110] : memref<32x128xf32, #tpu.memory_space<vmem>>, vector<32x128xf32>
    %cst_111 = arith.constant dense<0.000000e+00> : vector<8x128xf32>
    %255 = tpu.matmul %253, %254, %cst_111 {dimension_numbers = #tpu.dot_dimension_numbers<[1], [0], [0], [1], [0, 0, 1, 1], [], []>} : vector<8x32xf32>, vector<32x128xf32>, vector<8x128xf32> -> vector<8x128xf32>
    %c0_112 = arith.constant 0 : index
    %c0_113 = arith.constant 0 : index
    %256 = vector.load %arg29[%c0_112, %c0_113] : memref<1x128xf32, #tpu.memory_space<vmem>>, vector<1x128xf32>
    %257 = vector.broadcast %256 : vector<1x128xf32> to vector<8x128xf32>
    %258 = arith.addf %255, %257 : vector<8x128xf32>
    %cst_114 = arith.constant 0.000000e+00 : f32
    %259 = vector.broadcast %cst_114 : f32 to vector<8x128xf32>
    %260 = arith.maximumf %258, %259 : vector<8x128xf32>
    %c0_115 = arith.constant 0 : index
    %c0_116 = arith.constant 0 : index
    %261 = vector.load %arg30[%c0_115, %c0_116] : memref<128x32xf32, #tpu.memory_space<vmem>>, vector<128x32xf32>
    %cst_117 = arith.constant dense<0.000000e+00> : vector<8x32xf32>
    %262 = tpu.matmul %260, %261, %cst_117 {dimension_numbers = #tpu.dot_dimension_numbers<[1], [0], [0], [1], [0, 0, 1, 1], [], []>} : vector<8x128xf32>, vector<128x32xf32>, vector<8x32xf32> -> vector<8x32xf32>
    %c0_118 = arith.constant 0 : index
    %c0_119 = arith.constant 0 : index
    %263 = vector.load %arg31[%c0_118, %c0_119] : memref<1x32xf32, #tpu.memory_space<vmem>>, vector<1x32xf32>
    %264 = vector.broadcast %263 : vector<1x32xf32> to vector<8x32xf32>
    %265 = arith.addf %262, %264 : vector<8x32xf32>
    %266 = arith.addf %265, %253 : vector<8x32xf32>
    %cst_120 = arith.constant dense<0.000000e+00> : vector<8xf32>
    %267 = vector.multi_reduction <add>, %266, %cst_120 [1] : vector<8x32xf32> to vector<8xf32>
    %268 = vector.shape_cast %267 : vector<8xf32> to vector<8x1xf32>
    %cst_121 = arith.constant 3.200000e+01 : f32
    %269 = vector.broadcast %cst_121 : f32 to vector<8x1xf32>
    %270 = arith.divf %268, %269 : vector<8x1xf32>
    %271 = vector.broadcast %270 : vector<8x1xf32> to vector<8x32xf32>
    %272 = arith.subf %266, %271 : vector<8x32xf32>
    %273 = vector.broadcast %270 : vector<8x1xf32> to vector<8x32xf32>
    %274 = arith.subf %266, %273 : vector<8x32xf32>
    %275 = arith.mulf %272, %274 : vector<8x32xf32>
    %cst_122 = arith.constant dense<0.000000e+00> : vector<8xf32>
    %276 = vector.multi_reduction <add>, %275, %cst_122 [1] : vector<8x32xf32> to vector<8xf32>
    %277 = vector.shape_cast %276 : vector<8xf32> to vector<8x1xf32>
    %cst_123 = arith.constant 3.200000e+01 : f32
    %278 = vector.broadcast %cst_123 : f32 to vector<8x1xf32>
    %279 = arith.divf %277, %278 : vector<8x1xf32>
    %280 = vector.broadcast %270 : vector<8x1xf32> to vector<8x32xf32>
    %281 = arith.subf %266, %280 : vector<8x32xf32>
    %cst_124 = arith.constant 9.99999974E-6 : f32
    %282 = vector.broadcast %cst_124 : f32 to vector<8x1xf32>
    %283 = arith.addf %279, %282 : vector<8x1xf32>
    %284 = math.rsqrt %283 : vector<8x1xf32>
    %285 = vector.broadcast %284 : vector<8x1xf32> to vector<8x32xf32>
    %286 = arith.mulf %281, %285 : vector<8x32xf32>
    %c0_125 = arith.constant 0 : index
    %c0_126 = arith.constant 0 : index
    %287 = vector.load %arg26[%c0_125, %c0_126] : memref<1x32xf32, #tpu.memory_space<vmem>>, vector<1x32xf32>
    %288 = vector.broadcast %287 : vector<1x32xf32> to vector<8x32xf32>
    %289 = arith.mulf %286, %288 : vector<8x32xf32>
    %c0_127 = arith.constant 0 : index
    %c0_128 = arith.constant 0 : index
    %290 = vector.load %arg27[%c0_127, %c0_128] : memref<1x32xf32, #tpu.memory_space<vmem>>, vector<1x32xf32>
    %291 = vector.broadcast %290 : vector<1x32xf32> to vector<8x32xf32>
    %292 = arith.addf %289, %291 : vector<8x32xf32>
    %c0_129 = arith.constant 0 : index
    %c0_130 = arith.constant 0 : index
    %c0_131 = arith.constant 0 : index
    %293 = vector.load %arg32[%c0_129, %c0_130, %c0_131] : memref<1x8x32xf32, #tpu.memory_space<vmem>>, vector<1x8x32xf32>
    %294 = vector.shape_cast %293 : vector<1x8x32xf32> to vector<8x32xf32>
    %295 = vector.shape_cast %292 : vector<8x32xf32> to vector<1x8x32xf32>
    tpu.vector_store %arg32[%c0_129, %c0_130, %c0_131], %295 {strides = array<i32>} : memref<1x8x32xf32, #tpu.memory_space<vmem>>, vector<1x8x32xf32>,
    return
  }
  func.func @transform_0(%arg0: i32) -> (i32, i32, i32) {
    %c0_i32 = arith.constant 0 : i32
    %c0_i32_0 = arith.constant 0 : i32
    %c0_i32_1 = arith.constant 0 : i32
    return %arg0, %c0_i32, %c0_i32_0 : i32, i32, i32
  }
  func.func @transform_1(%arg0: i32) -> (i32, i32, i32) {
    %c0_i32 = arith.constant 0 : i32
    %c0_i32_0 = arith.constant 0 : i32
    %c0_i32_1 = arith.constant 0 : i32
    return %arg0, %c0_i32, %c0_i32_0 : i32, i32, i32
  }
  func.func @transform_2(%arg0: i32) -> (i32, i32, i32) {
    %c0_i32 = arith.constant 0 : i32
    %c0_i32_0 = arith.constant 0 : i32
    %c0_i32_1 = arith.constant 0 : i32
    return %arg0, %c0_i32, %c0_i32_0 : i32, i32, i32
  }
  func.func @transform_3(%arg0: i32) -> (i32, i32) {
    %c0_i32 = arith.constant 0 : i32
    %c0_i32_0 = arith.constant 0 : i32
    %c0_i32_1 = arith.constant 0 : i32
    return %c0_i32, %c0_i32_0 : i32, i32
  }
  func.func @transform_4(%arg0: i32) -> (i32, i32) {
    %c0_i32 = arith.constant 0 : i32
    %c0_i32_0 = arith.constant 0 : i32
    %c0_i32_1 = arith.constant 0 : i32
    return %c0_i32, %c0_i32_0 : i32, i32
  }
  func.func @transform_5(%arg0: i32) -> (i32, i32) {
    %c0_i32 = arith.constant 0 : i32
    %c0_i32_0 = arith.constant 0 : i32
    %c0_i32_1 = arith.constant 0 : i32
    return %c0_i32, %c0_i32_0 : i32, i32
  }
  func.func @transform_6(%arg0: i32) -> (i32, i32) {
    %c0_i32 = arith.constant 0 : i32
    %c0_i32_0 = arith.constant 0 : i32
    %c0_i32_1 = arith.constant 0 : i32
    return %c0_i32, %c0_i32_0 : i32, i32
  }
  func.func @transform_7(%arg0: i32) -> (i32, i32) {
    %c0_i32 = arith.constant 0 : i32
    %c0_i32_0 = arith.constant 0 : i32
    %c0_i32_1 = arith.constant 0 : i32
    return %c0_i32, %c0_i32_0 : i32, i32
  }
  func.func @transform_8(%arg0: i32) -> (i32, i32) {
    %c0_i32 = arith.constant 0 : i32
    %c0_i32_0 = arith.constant 0 : i32
    %c0_i32_1 = arith.constant 0 : i32
    return %c0_i32, %c0_i32_0 : i32, i32
  }
  func.func @transform_9(%arg0: i32) -> (i32, i32) {
    %c0_i32 = arith.constant 0 : i32
    %c0_i32_0 = arith.constant 0 : i32
    %c0_i32_1 = arith.constant 0 : i32
    return %c0_i32, %c0_i32_0 : i32, i32
  }
  func.func @transform_10(%arg0: i32) -> (i32, i32) {
    %c0_i32 = arith.constant 0 : i32
    %c0_i32_0 = arith.constant 0 : i32
    %c0_i32_1 = arith.constant 0 : i32
    return %c0_i32, %c0_i32_0 : i32, i32
  }
  func.func @transform_11(%arg0: i32) -> (i32, i32) {
    %c0_i32 = arith.constant 0 : i32
    %c0_i32_0 = arith.constant 0 : i32
    %c0_i32_1 = arith.constant 0 : i32
    return %c0_i32, %c0_i32_0 : i32, i32
  }
  func.func @transform_12(%arg0: i32) -> (i32, i32) {
    %c0_i32 = arith.constant 0 : i32
    %c0_i32_0 = arith.constant 0 : i32
    %c0_i32_1 = arith.constant 0 : i32
    return %c0_i32, %c0_i32_0 : i32, i32
  }
  func.func @transform_13(%arg0: i32) -> (i32, i32) {
    %c0_i32 = arith.constant 0 : i32
    %c0_i32_0 = arith.constant 0 : i32
    %c0_i32_1 = arith.constant 0 : i32
    return %c0_i32, %c0_i32_0 : i32, i32
  }
  func.func @transform_14(%arg0: i32) -> (i32, i32) {
    %c0_i32 = arith.constant 0 : i32
    %c0_i32_0 = arith.constant 0 : i32
    %c0_i32_1 = arith.constant 0 : i32
    return %c0_i32, %c0_i32_0 : i32, i32
  }
  func.func @transform_15(%arg0: i32) -> (i32, i32) {
    %c0_i32 = arith.constant 0 : i32
    %c0_i32_0 = arith.constant 0 : i32
    %c0_i32_1 = arith.constant 0 : i32
    return %c0_i32, %c0_i32_0 : i32, i32
  }
  func.func @transform_16(%arg0: i32) -> (i32, i32) {
    %c0_i32 = arith.constant 0 : i32
    %c0_i32_0 = arith.constant 0 : i32
    %c0_i32_1 = arith.constant 0 : i32
    return %c0_i32, %c0_i32_0 : i32, i32
  }
  func.func @transform_17(%arg0: i32) -> (i32, i32) {
    %c0_i32 = arith.constant 0 : i32
    %c0_i32_0 = arith.constant 0 : i32
    %c0_i32_1 = arith.constant 0 : i32
    return %c0_i32, %c0_i32_0 : i32, i32
  }
  func.func @transform_18(%arg0: i32) -> (i32, i32) {
    %c0_i32 = arith.constant 0 : i32
    %c0_i32_0 = arith.constant 0 : i32
    %c0_i32_1 = arith.constant 0 : i32
    return %c0_i32, %c0_i32_0 : i32, i32
  }
  func.func @transform_19(%arg0: i32) -> (i32, i32) {
    %c0_i32 = arith.constant 0 : i32
    %c0_i32_0 = arith.constant 0 : i32
    %c0_i32_1 = arith.constant 0 : i32
    return %c0_i32, %c0_i32_0 : i32, i32
  }
  func.func @transform_20(%arg0: i32) -> (i32, i32) {
    %c0_i32 = arith.constant 0 : i32
    %c0_i32_0 = arith.constant 0 : i32
    %c0_i32_1 = arith.constant 0 : i32
    return %c0_i32, %c0_i32_0 : i32, i32
  }
  func.func @transform_21(%arg0: i32) -> (i32, i32) {
    %c0_i32 = arith.constant 0 : i32
    %c0_i32_0 = arith.constant 0 : i32
    %c0_i32_1 = arith.constant 0 : i32
    return %c0_i32, %c0_i32_0 : i32, i32
  }
  func.func @transform_22(%arg0: i32) -> (i32, i32) {
    %c0_i32 = arith.constant 0 : i32
    %c0_i32_0 = arith.constant 0 : i32
    %c0_i32_1 = arith.constant 0 : i32
    return %c0_i32, %c0_i32_0 : i32, i32
  }
  func.func @transform_23(%arg0: i32) -> (i32, i32) {
    %c0_i32 = arith.constant 0 : i32
    %c0_i32_0 = arith.constant 0 : i32
    %c0_i32_1 = arith.constant 0 : i32
    return %c0_i32, %c0_i32_0 : i32, i32
  }
  func.func @transform_24(%arg0: i32) -> (i32, i32) {
    %c0_i32 = arith.constant 0 : i32
    %c0_i32_0 = arith.constant 0 : i32
    %c0_i32_1 = arith.constant 0 : i32
    return %c0_i32, %c0_i32_0 : i32, i32
  }
  func.func @transform_25(%arg0: i32) -> (i32, i32) {
    %c0_i32 = arith.constant 0 : i32
    %c0_i32_0 = arith.constant 0 : i32
    %c0_i32_1 = arith.constant 0 : i32
    return %c0_i32, %c0_i32_0 : i32, i32
  }
  func.func @transform_26(%arg0: i32) -> (i32, i32) {
    %c0_i32 = arith.constant 0 : i32
    %c0_i32_0 = arith.constant 0 : i32
    %c0_i32_1 = arith.constant 0 : i32
    return %c0_i32, %c0_i32_0 : i32, i32
  }
  func.func @transform_27(%arg0: i32) -> (i32, i32) {
    %c0_i32 = arith.constant 0 : i32
    %c0_i32_0 = arith.constant 0 : i32
    %c0_i32_1 = arith.constant 0 : i32
    return %c0_i32, %c0_i32_0 : i32, i32
  }
  func.func @transform_28(%arg0: i32) -> (i32, i32) {
    %c0_i32 = arith.constant 0 : i32
    %c0_i32_0 = arith.constant 0 : i32
    %c0_i32_1 = arith.constant 0 : i32
    return %c0_i32, %c0_i32_0 : i32, i32
  }
  func.func @transform_29(%arg0: i32) -> (i32, i32) {
    %c0_i32 = arith.constant 0 : i32
    %c0_i32_0 = arith.constant 0 : i32
    %c0_i32_1 = arith.constant 0 : i32
    return %c0_i32, %c0_i32_0 : i32, i32
  }
  func.func @transform_30(%arg0: i32) -> (i32, i32) {
    %c0_i32 = arith.constant 0 : i32
    %c0_i32_0 = arith.constant 0 : i32
    %c0_i32_1 = arith.constant 0 : i32
    return %c0_i32, %c0_i32_0 : i32, i32
  }
  func.func @transform_31(%arg0: i32) -> (i32, i32, i32) {
    %c0_i32 = arith.constant 0 : i32
    %c0_i32_0 = arith.constant 0 : i32
    %c0_i32_1 = arith.constant 0 : i32
    return %arg0, %c0_i32, %c0_i32_0 : i32, i32, i32
  }
}

</mosaic_0001>

<bundles_post_ra>
// kernel: decoder_block_forward.1
= control target key start
LH: loop header
LB: loop body
LE: loop exit
PB: predicated region body
PF: predicated region fallthrough
CT: control target
= control target key end

     0   :  { %s5743_s6 = smov 1   ;;  %s5744_s10 = smov 2   ;;  %s6603_s0 = inlined_call_operand.smem [shape: u32[32], index: -1, kind: input, shape index: {}] }
   0x1   :  { %s5810_s5 = sld [smem:[%s6603_s0]]   ;;  %s5745_s14 = smov 3  }
   0x2   :  { %s5815_s9 = sld [smem:[%s6603_s0 + %s5743_s6]]   ;;  %s5746_s18 = smov 4  }
   0x3   :  { %s5820_s13 = sld [smem:[%s6603_s0 + %s5744_s10]]   ;;  %s5747_s22 = smov 5  }
   0x4   :  { %s5825_s17 = sld [smem:[%s6603_s0 + %s5745_s14]]   ;;  %s5748_s26 = smov 6  }
   0x5   :  { %s5830_s21 = sld [smem:[%s6603_s0 + %s5746_s18]]   ;;  %s5749_s30 = smov 7  }
   0x6   :  { %s5835_s25 = sld [smem:[%s6603_s0 + %s5747_s22]]   ;;  %s5750_s4 = smov 8  }
   0x7   :  { %6625 = sst [smem:[#allocation47_spill]] %s5810_s5  ;;  %s5751_s10 = smov 9  }
   0x8   :  { %6626 = sst [smem:[#allocation48_spill]] %s5815_s9  ;;  %s5752_s15 = smov 10  }
   0x9   :  { %6627 = sst [smem:[#allocation49_spill]] %s5820_s13  ;;  %s5753_s20 = smov 11  }
   0xa   :  { %6628 = sst [smem:[#allocation50_spill]] %s5825_s17  ;;  %s5755_s1 = smov 13  }
   0xb   :  { %6629 = sst [smem:[#allocation51_spill]] %s5830_s21  ;;  %s5756_s7 = smov 14  }
   0xc   :  { %6630 = sst [smem:[#allocation52_spill]] %s5835_s25  ;;  %s5758_s22 = smov 16  }
   0xd   :  { %s5840_s29 = sld [smem:[%s6603_s0 + %s5748_s26]]   ;;  %s5754_s26 = smov 12  }
   0xe   :  { %s5845_s3 = sld [smem:[%s6603_s0 + %s5749_s30]]   ;;  %s5759_s28 = smov 17  }
   0xf   :  { %s5850_s8 = sld [smem:[%s6603_s0 + %s5750_s4]]  }
  0x10   :  { %s5855_s14 = sld [smem:[%s6603_s0 + %s5751_s10]]  }
  0x11   :  { %s5860_s19 = sld [smem:[%s6603_s0 + %s5752_s15]]   ;;  %s5757_s15 = smov 15  }
  0x12   :  { %s5865_s24 = sld [smem:[%s6603_s0 + %s5753_s20]]  }
  0x13   :  { %6631 = sst [smem:[#allocation53_spill]] %s5840_s29 }
  0x14   :  { %6632 = sst [smem:[#allocation54_spill]] %s5845_s3 }
  0x15   :  { %6633 = sst [smem:[#allocation55_spill]] %s5850_s8 }
  0x16   :  { %6634 = sst [smem:[#allocation56_spill]] %s5855_s14 }
  0x17   :  { %s5870_s30 = sld [smem:[%s6603_s0 + %s5754_s26]]  }
  0x18   :  { %6635 = sst [smem:[#allocation57_spill]] %s5865_s24 }
  0x19   :  { %s5875_s6 = sld [smem:[%s6603_s0 + %s5755_s1]]  }
  0x1a   :  { %s5880_s12 = sld [smem:[%s6603_s0 + %s5756_s7]]   ;;  %s5760_s7 = smov 18  }
  0x1b   :  { %s5885_s20 = sld [smem:[%s6603_s0 + %s5757_s15]]   ;;  %s5761_s15 = smov 19  }
  0x1c   :  { %s5890_s27 = sld [smem:[%s6603_s0 + %s5758_s22]]   ;;  %s5762_s22 = smov 20  }
  0x1d   :  { %s5895_s4 = sld [smem:[%s6603_s0 + %s5759_s28]]   ;;  %s5763_s28 = smov 21  }
  0x1e   :  { %s5900_s21 = sld [smem:[%s6603_s0 + %s5760_s7]]   ;;  %s5764_s7 = smov 22  }
  0x1f   :  { %6636 = sst [smem:[#allocation58_spill]] %s5875_s6 }
  0x20   :  { %6637 = sst [smem:[#allocation59_spill]] %s5880_s12 }
  0x21   :  { %s5905_s9 = sld [smem:[%s6603_s0 + %s5761_s15]]   ;;  %s5765_s15 = smov 23  }
  0x22   :  { %s5910_s13 = sld [smem:[%s6603_s0 + %s5762_s22]]   ;;  %s5766_s22 = smov 24  }
  0x23   :  { %6638 = sst [smem:[#allocation60_spill]] %s5895_s4 }
  0x24   :  { %s5915_s24 = sld [smem:[%s6603_s0 + %s5763_s28]]   ;;  %s5767_s28 = smov 25  }
  0x25   :  { %s5920_s17 = sld [smem:[%s6603_s0 + %s5764_s7]]   ;;  %s5768_s7 = smov 26  }
  0x26   :  { %s5925_s3 = sld [smem:[%s6603_s0 + %s5765_s15]]   ;;  %s5769_s15 = smov 27  }
  0x27   :  { %6639 = sst [smem:[#allocation61_spill]] %s5905_s9 }
  0x28   :  { %6640 = sst [smem:[#allocation62_spill]] %s5910_s13 }
  0x29   :  { %s5930_s29 = sld [smem:[%s6603_s0 + %s5766_s22]]   ;;  %s5770_s22 = smov 28  }
  0x2a   :  { %s5935_s25 = sld [smem:[%s6603_s0 + %s5767_s28]]   ;;  %s5771_s28 = smov 29  }
  0x2b   :  { %6641 = sst [smem:[#allocation63_spill]] %s5920_s17 }
  0x2c   :  { %6642 = sst [smem:[#allocation64_spill]] %s5925_s3 }
  0x2d   :  { %s5940_s5 = sld [smem:[%s6603_s0 + %s5768_s7]]   ;;  %s5772_s7 = smov 30  }
  0x2e   :  { %s5945_s17 = sld [smem:[%s6603_s0 + %s5769_s15]]   ;;  %s5773_s15 = smov 31  }
  0x2f   :  { %6643 = sst [smem:[#allocation65_spill]] %s5930_s29 }
  0x30   :  { %6644 = sst [smem:[#allocation66_spill]] %s5935_s25 }
  0x31   :  { %s5950_s29 = sld [smem:[%s6603_s0 + %s5770_s22]]  }
  0x32   :  { %s5955_s25 = sld [smem:[%s6603_s0 + %s5771_s28]]  }
  0x33   :  { %6645 = sst [smem:[#allocation67_spill]] %s5940_s5 }
  0x34   :  { %s5960_s5 = sld [smem:[%s6603_s0 + %s5772_s7]]  }
  0x35   :  { %s5965_s13 = sld [smem:[%s6603_s0 + %s5773_s15]]  }
  0x38   :  { %6646 = sst [smem:[#allocation68_spill]] %s5955_s25 }
  0x3a   :  { %6647 = sst [smem:[#allocation69_spill]] %s5960_s5 }
  0x3b   :  { %6648 = sst [smem:[#allocation70_spill]] %s5965_s13 }
  0x3c   :  { %68 = vsyncpa [#allocation3], 0 }
  0x3d   :  { %70 = vsyncpa [#allocation3 + $0x1], 0 }
  0x3e   :  { %71 = vsyncpa [#allocation6], 0 }
  0x3f   :  { %72 = vsyncpa [#allocation9], 0 }
  0x40   :  { %73 = vsyncpa [#allocation12], 0 }
  0x41   :  { %74 = vsyncpa [#allocation15], 0 }
  0x42   :  { %75 = vsyncpa [#allocation18], 0 }
  0x43   :  { %76 = vsyncpa [#allocation21], 0 }
  0x44   :  { %77 = vsyncpa [#allocation24], 0 }
  0x45   :  { %78 = vsyncpa [#allocation27], 0 }
  0x46   :  { %79 = vsyncpa [#allocation30], 0 }
  0x47   :  { %80 = vsyncpa [#allocation33], 0 }
  0x48   :  { %81 = vsyncpa [#allocation4], 0 }
  0x49   :  { %83 = vsyncpa [#allocation4 + $0x1], 0  ;;  %s5967_s22 = smov 0   ;;  %s5969_s23 = smov 0  }
  0x4a   :  { %s5971_s0 = smov 0   ;;  %s5973_s26 = smov 0  }
  0x4b LB: > { %s5774_s28 = smov [#allocation5]   ;;  %s5988_s2 = sadd.s32 4294967295, %s5741_s26   ;;  %s5741_s26 = sphi %s5973_s26, %s6713_s26   ;;  %s5737_s0 = sphi %s5971_s0, %s6712_s0   ;;  %s5733_s23 = sphi %s5969_s23, %s6711_s23   ;;  %s5729_s22 = sphi %s5967_s22, %s6710_s22  }
  0x4c   : > { %s814_s1 = sshll.u32 %s5774_s28, 4  ;;  %p4328_p0 = scmp.ge.s32.totalorder %s5741_s26, 1  ;;  %s815_s1 = int_to_ptr.vmem [resolvable:$true] %s814_s1 }
  0x4d   : > { %p6611_p1 = scmp.eq.s32.totalorder %s5988_s2, 0  ;;  %p786_p2 = scmp.lt.s32.totalorder %s5741_s26, 3 }
  0x4e   : > { %s5775_s10 = smov [#allocation8]   ;;  %s5776_s15 = smov [#allocation11]  }
  0x4f   : > { %p5993_p3 = pnand %p4328_p0, %p786_p2  ;;  %s836_s11 = sshll.u32 %s5775_s10, 4  ;;  %s837_s11 = int_to_ptr.vmem [resolvable:$true] %s836_s11 }
  0x50   : > { %s860_s16 = sshll.u32 %s5776_s15, 4  ;;  %s5126_s13 = scalar_lea.vmem %s815_s1, 16  ;;  %s6006_s16 = int_to_ptr.vmem [resolvable:$true] %s860_s16 }
  0x51   : > { %s6649_s7 = scalar_select %p5993_p3, 1, 0 }
  0x52   : > { %p4882_p5 = pneg %p5993_p3  ;;  %p5127_p8 = scmp.ne.s32.totalorder %s815_s1, %s5126_s13 }
  0x53   : > { %s5133_s10 = scalar_lea.vmem %s815_s1, 32  ;;  %p5134_p11 = scmp.lt.s32.totalorder %s815_s1, %s815_s1 }
  0x54   : > { %p6002_p6 = pnand %p4882_p5, %p6611_p1  ;;  %p5135_p12 = scmp.lt.s32.totalorder %s5133_s10, %s5126_s13 }
  0x56   : > { %p6010_p7 = pneg %p6002_p6  ;;  %p5136_p13 = por %p5135_p12, %p5134_p11 }
  0x58   : > { %p5129_p9 = pnand %p5127_p8, %p6010_p7 }
  0x5a   : > { %p5130_p10 = pneg %p5129_p9 }
  0x5c   : > { %p5137_p0 = pnand %p5136_p13, %p5130_p10 }
  0x5e   : > { %5140 = shalt.err (!%p5137_p0)
}
  0x5f   : > { %s6652_s8 = sld [smem:[#allocation55_spill]]  ;;  %s5152_s15 = scalar_lea.vmem %s837_s11, 16 }
  0x60   : > { %p5153_p2 = scmp.ne.s32.totalorder %s837_s11, %s5152_s15  ;;  %s5159_s25 = scalar_lea.vmem %s837_s11, 32 }
  0x61   : > { %p5160_p1 = scmp.lt.s32.totalorder %s837_s11, %s837_s11  ;;  %p5161_p8 = scmp.lt.s32.totalorder %s5159_s25, %s5152_s15 }
  0x62   : > { %p5155_p5 = pnand %p5153_p2, %p6010_p7 }
  0x63   : > { %p5162_p9 = por %p5161_p8, %p5160_p1 }
  0x64   : > { %p5156_p4 = pneg %p5155_p5 }
  0x65   : > { %4885 = dma.hbm_to_vmem [thread:$0]  (!%p6002_p6), %s6652_s8, 16, %s815_s1, [#allocation6]  }
  0x66   : > { %p5163_p3 = pnand %p5162_p9, %p5156_p4 }
  0x68   : > { %5166 = shalt.err (!%p5163_p3)
}
  0x69   : > { %4891 = dma.hbm_to_vmem [thread:$0]  (!%p6002_p6), %s5860_s19, 16, %s837_s11, [#allocation9]  }
  0x6a   : > { %s5178_s13 = scalar_lea.vmem %s6006_s16, 512  ;;  %p5186_p13 = scmp.lt.s32.totalorder %s6006_s16, %s6006_s16 }
  0x6b   : > { %p5179_p10 = scmp.ne.s32.totalorder %s6006_s16, %s5178_s13  ;;  %p5187_p0 = scmp.lt.s32.totalorder %s5178_s13, %s5178_s13 }
  0x6d   : > { %p5181_p11 = pnand %p5179_p10, %p6010_p7  ;;  %p5188_p2 = por %p5187_p0, %p5186_p13 }
  0x6f   : > { %p5182_p12 = pneg %p5181_p11 }
  0x71   : > { %p5189_p1 = pnand %p5188_p2, %p5182_p12 }
  0x73   : > { %5192 = shalt.err (!%p5189_p1)
}
  0x74   : > { %s6613_s25 = smov 128   ;;  %s6653_s6 = sld [smem:[#allocation58_spill]] }
  0x75   : > { %s6615_s1 = smov 8   ;;  %s5779_s11 = smov [#allocation14]  }
  0x76   : > { %s886_s10 = sshll.u32 %s5779_s11, 4  ;;  %s5780_s15 = smov [#allocation17]   ;;  %s887_s10 = int_to_ptr.vmem [resolvable:$true] %s886_s10 }
  0x77   : > { %s911_s8 = sshll.u32 %s5780_s15, 4  ;;  %s5204_s13 = scalar_lea.vmem %s887_s10, 512  ;;  %s912_s8 = int_to_ptr.vmem [resolvable:$true] %s911_s8 }
  0x78   : > { %p5205_p3 = scmp.ne.s32.totalorder %s887_s10, %s5204_s13  ;;  %p5212_p8 = scmp.lt.s32.totalorder %s887_s10, %s887_s10 }
  0x79   : > { %p5213_p9 = scmp.lt.s32.totalorder %s5204_s13, %s5204_s13 }
  0x7a   : > { %4897 = dma.hbm_to_vmem [thread:$0]  (!%p6002_p6), %s6653_s6, 512, %s6006_s16, [#allocation12], %s6613_s25, %s6613_s25, %s6615_s1  }
  0x7b   : > { %p5207_p4 = pnand %p5205_p3, %p6010_p7  ;;  %p5214_p10 = por %p5213_p9, %p5212_p8 }
  0x7d   : > { %p5208_p5 = pneg %p5207_p4 }
  0x7f   : > { %p5215_p11 = pnand %p5214_p10, %p5208_p5 }
  0x81   : > { %5218 = shalt.err (!%p5215_p11)
}
  0x82   : > { %4903 = dma.hbm_to_vmem [thread:$0]  (!%p6002_p6), %s5885_s20, 512, %s887_s10, [#allocation15], %s6613_s25, %s6613_s25, %s6615_s1  }
  0x83   : > { %s5230_s16 = scalar_lea.vmem %s912_s8, 16  ;;  %s5237_s11 = scalar_lea.vmem %s912_s8, 32 }
  0x84   : > { %p5231_p12 = scmp.ne.s32.totalorder %s912_s8, %s5230_s16  ;;  %p5238_p2 = scmp.lt.s32.totalorder %s912_s8, %s912_s8 }
  0x85   : > { %p5239_p1 = scmp.lt.s32.totalorder %s5237_s11, %s5230_s16 }
  0x86   : > { %p5233_p13 = pnand %p5231_p12, %p6010_p7 }
  0x87   : > { %p5240_p3 = por %p5239_p1, %p5238_p2 }
  0x88   : > { %p5234_p0 = pneg %p5233_p13 }
  0x8a   : > { %p5241_p4 = pnand %p5240_p3, %p5234_p0 }
  0x8c   : > { %5244 = shalt.err (!%p5241_p4)
}
  0x8d   : > { %s6654_s4 = sld [smem:[#allocation60_spill]]  ;;  %s5781_s15 = smov [#allocation20]  }
  0x8e   : > { %s932_s13 = sshll.u32 %s5781_s15, 4  ;;  %s5782_s10 = smov [#allocation23]   ;;  %s933_s13 = int_to_ptr.vmem [resolvable:$true] %s932_s13 }
  0x8f   : > { %s957_s25 = sshll.u32 %s5782_s10, 4  ;;  %s5256_s1 = scalar_lea.vmem %s933_s13, 512  ;;  %s958_s25 = int_to_ptr.vmem [resolvable:$true] %s957_s25 }
  0x90   : > { %p5257_p5 = scmp.ne.s32.totalorder %s933_s13, %s5256_s1  ;;  %p5264_p10 = scmp.lt.s32.totalorder %s933_s13, %s933_s13 }
  0x91   : > { %p5265_p11 = scmp.lt.s32.totalorder %s5256_s1, %s5256_s1 }
  0x92   : > { %p5259_p8 = pnand %p5257_p5, %p6010_p7 }
  0x93   : > { %4909 = dma.hbm_to_vmem [thread:$0]  (!%p6002_p6), %s6654_s4, 16, %s912_s8, [#allocation18]  }
  0x94   : > { %p5260_p9 = pneg %p5259_p8  ;;  %p5266_p12 = por %p5265_p11, %p5264_p10 }
  0x96   : > { %p5267_p13 = pnand %p5266_p12, %p5260_p9 }
  0x98   : > { %5270 = shalt.err (!%p5267_p13)
}
  0x99   : > { %s6655_s16 = smov 8   ;;  %s6656_s11 = smov 128  }
  0x9a   : > { %s6657_s9 = sld [smem:[#allocation61_spill]]  ;;  %s5282_s8 = scalar_lea.vmem %s958_s25, 16 }
  0x9b   : > { %p5283_p0 = scmp.ne.s32.totalorder %s958_s25, %s5282_s8  ;;  %s5289_s15 = scalar_lea.vmem %s958_s25, 32 }
  0x9c   : > { %p5290_p3 = scmp.lt.s32.totalorder %s958_s25, %s958_s25  ;;  %p5291_p4 = scmp.lt.s32.totalorder %s5289_s15, %s5282_s8 }
  0x9d   : > { %p5285_p2 = pnand %p5283_p0, %p6010_p7 }
  0x9e   : > { %p5292_p5 = por %p5291_p4, %p5290_p3 }
  0x9f   : > { %p5286_p1 = pneg %p5285_p2 }
  0xa0   : > { %4915 = dma.hbm_to_vmem [thread:$0]  (!%p6002_p6), %s6657_s9, 512, %s933_s13, [#allocation21], %s6656_s11, %s6656_s11, %s6655_s16  }
  0xa1   : > { %p5293_p8 = pnand %p5292_p5, %p5286_p1 }
  0xa3   : > { %5296 = shalt.err (!%p5293_p8)
}
  0xa4   : > { %4921 = dma.hbm_to_vmem [thread:$0]  (!%p6002_p6), %s5915_s24, 16, %s958_s25, [#allocation24]  }
  0xa5   : > { %s5783_s1 = smov [#allocation26]   ;;  %s5784_s13 = smov [#allocation29]  }
  0xa6   : > { %s979_s10 = sshll.u32 %s5783_s1, 4  ;;  %s1006_s4 = sshll.u32 %s5784_s13, 4  ;;  %s980_s10 = int_to_ptr.vmem [resolvable:$true] %s979_s10  ;;  %s1007_s4 = int_to_ptr.vmem [resolvable:$true] %s1006_s4 }
  0xa7   : > { %s5308_s6 = scalar_lea.vmem %s980_s10, 16  ;;  %s5315_s9 = scalar_lea.vmem %s980_s10, 32 }
  0xa8   : > { %p5309_p9 = scmp.ne.s32.totalorder %s980_s10, %s5308_s6  ;;  %p5316_p12 = scmp.lt.s32.totalorder %s980_s10, %s980_s10 }
  0xa9   : > { %p5317_p13 = scmp.lt.s32.totalorder %s5315_s9, %s5308_s6 }
  0xaa   : > { %p5311_p10 = pnand %p5309_p9, %p6010_p7 }
  0xab   : > { %p5318_p0 = por %p5317_p13, %p5316_p12 }
  0xac   : > { %p5312_p11 = pneg %p5311_p10 }
  0xae   : > { %p5319_p2 = pnand %p5318_p0, %p5312_p11 }
  0xb0   : > { %5322 = shalt.err (!%p5319_p2)
}
  0xb1   : > { %s6658_s3 = sld [smem:[#allocation64_spill]]  ;;  %s5334_s25 = scalar_lea.vmem %s1007_s4, 512 }
  0xb2   : > { %p5335_p1 = scmp.ne.s32.totalorder %s1007_s4, %s5334_s25  ;;  %p5342_p5 = scmp.lt.s32.totalorder %s1007_s4, %s1007_s4 }
  0xb3   : > { %p5343_p8 = scmp.lt.s32.totalorder %s5334_s25, %s5334_s25 }
  0xb4   : > { %p5337_p3 = pnand %p5335_p1, %p6010_p7 }
  0xb5   : > { %p5344_p9 = por %p5343_p8, %p5342_p5 }
  0xb6   : > { %p5338_p4 = pneg %p5337_p3 }
  0xb7   : > { %4927 = dma.hbm_to_vmem [thread:$0]  (!%p6002_p6), %s6658_s3, 16, %s980_s10, [#allocation27]  }
  0xb8   : > { %p5345_p10 = pnand %p5344_p9, %p5338_p4 }
  0xba   : > { %5348 = shalt.err (!%p5345_p10)
}
  0xbb   : > { %4933 = dma.hbm_to_vmem [thread:$0]  (!%p6002_p6), %s5945_s17, 512, %s1007_s4, [#allocation30], %s6656_s11, %s6656_s11, %s6655_s16  }
  0xbc   : > { %s5785_s9 = smov [#allocation7]   ;;  %s5786_s8 = smov [#allocation10]  }
  0xbd   : > { %s825_s6 = sshll.u32 %s5785_s9, 4  ;;  %s850_s15 = sshll.u32 %s5786_s8, 4  ;;  %s826_s6 = int_to_ptr.vmem [resolvable:$true] %s825_s6  ;;  %s851_s15 = int_to_ptr.vmem [resolvable:$true] %s850_s15 }
  0xbe   : > { %s5360_s1 = scalar_lea.vmem %s826_s6, 16  ;;  %s5367_s10 = scalar_lea.vmem %s826_s6, 32 }
  0xbf   : > { %p5361_p11 = scmp.ne.s32.totalorder %s826_s6, %s5360_s1  ;;  %p5368_p0 = scmp.lt.s32.totalorder %s826_s6, %s826_s6 }
  0xc0   : > { %p5369_p2 = scmp.lt.s32.totalorder %s5367_s10, %s5360_s1 }
  0xc1   : > { %p5363_p12 = pnand %p5361_p11, %p6010_p7 }
  0xc2   : > { %p5370_p1 = por %p5369_p2, %p5368_p0 }
  0xc3   : > { %p5364_p13 = pneg %p5363_p12 }
  0xc5   : > { %p5371_p3 = pnand %p5370_p1, %p5364_p13 }
  0xc7   : > { %5374 = shalt.err (!%p5371_p3)
}
  0xc8   : > { %s6659_s14 = sld [smem:[#allocation56_spill]]  ;;  %s5386_s4 = scalar_lea.vmem %s851_s15, 16 }
  0xc9   : > { %p5387_p4 = scmp.ne.s32.totalorder %s851_s15, %s5386_s4  ;;  %s5393_s13 = scalar_lea.vmem %s851_s15, 32 }
  0xca   : > { %p5394_p9 = scmp.lt.s32.totalorder %s851_s15, %s851_s15  ;;  %p5395_p10 = scmp.lt.s32.totalorder %s5393_s13, %s5386_s4 }
  0xcb   : > { %p5389_p5 = pnand %p5387_p4, %p6010_p7 }
  0xcc   : > { %p5396_p11 = por %p5395_p10, %p5394_p9 }
  0xcd   : > { %p5390_p8 = pneg %p5389_p5 }
  0xce   : > { %4888 = dma.hbm_to_vmem [thread:$0]  (!%p6002_p6), %s6659_s14, 16, %s826_s6, [#allocation6]  }
  0xcf   : > { %p5397_p12 = pnand %p5396_p11, %p5390_p8 }
  0xd1   : > { %5400 = shalt.err (!%p5397_p12)
}
  0xd2   : > { %4894 = dma.hbm_to_vmem [thread:$0]  (!%p6002_p6), %s5870_s30, 16, %s851_s15, [#allocation9]  }
  0xd3   : > { %s5787_s25 = smov [#allocation13]   ;;  %s5788_s6 = smov [#allocation16]  }
  0xd4   : > { %s873_s9 = sshll.u32 %s5787_s25, 4  ;;  %s900_s8 = sshll.u32 %s5788_s6, 4  ;;  %s874_s9 = int_to_ptr.vmem [resolvable:$true] %s873_s9  ;;  %s901_s8 = int_to_ptr.vmem [resolvable:$true] %s900_s8 }
  0xd5   : > { %s5412_s1 = scalar_lea.vmem %s874_s9, 512  ;;  %p5420_p1 = scmp.lt.s32.totalorder %s874_s9, %s874_s9 }
  0xd6   : > { %p5413_p13 = scmp.ne.s32.totalorder %s874_s9, %s5412_s1  ;;  %p5421_p3 = scmp.lt.s32.totalorder %s5412_s1, %s5412_s1 }
  0xd8   : > { %p5415_p0 = pnand %p5413_p13, %p6010_p7  ;;  %p5422_p4 = por %p5421_p3, %p5420_p1 }
  0xda   : > { %p5416_p2 = pneg %p5415_p0 }
  0xdc   : > { %p5423_p5 = pnand %p5422_p4, %p5416_p2 }
  0xde   : > { %5426 = shalt.err (!%p5423_p5)
}
  0xdf   : > { %s6660_s12 = sld [smem:[#allocation59_spill]]  ;;  %s5438_s15 = scalar_lea.vmem %s901_s8, 16 }
  0xe0   : > { %p5439_p8 = scmp.ne.s32.totalorder %s901_s8, %s5438_s15  ;;  %s5445_s10 = scalar_lea.vmem %s901_s8, 32 }
  0xe1   : > { %p5446_p11 = scmp.lt.s32.totalorder %s901_s8, %s901_s8  ;;  %p5447_p12 = scmp.lt.s32.totalorder %s5445_s10, %s5438_s15 }
  0xe2   : > { %p5441_p9 = pnand %p5439_p8, %p6010_p7 }
  0xe3   : > { %p5448_p13 = por %p5447_p12, %p5446_p11 }
  0xe4   : > { %p5442_p10 = pneg %p5441_p9 }
  0xe5   : > { %4900 = dma.hbm_to_vmem [thread:$0]  (!%p6002_p6), %s6660_s12, 512, %s874_s9, [#allocation12], %s6656_s11, %s6656_s11, %s6655_s16  }
  0xe6   : > { %p5449_p0 = pnand %p5448_p13, %p5442_p10 }
  0xe8   : > { %5452 = shalt.err (!%p5449_p0)
}
  0xe9   : > { %4906 = dma.hbm_to_vmem [thread:$0]  (!%p6002_p6), %s5890_s27, 16, %s901_s8, [#allocation15]  }
  0xea   : > { %s5789_s4 = smov [#allocation19]   ;;  %s5790_s16 = smov [#allocation22]  }
  0xeb   : > { %s922_s13 = sshll.u32 %s5789_s4, 4  ;;  %s946_s11 = sshll.u32 %s5790_s16, 4  ;;  %s923_s13 = int_to_ptr.vmem [resolvable:$true] %s922_s13  ;;  %s947_s11 = int_to_ptr.vmem [resolvable:$true] %s946_s11 }
  0xec   : > { %s5464_s25 = scalar_lea.vmem %s923_s13, 16  ;;  %s5471_s9 = scalar_lea.vmem %s923_s13, 32 }
  0xed   : > { %p5465_p2 = scmp.ne.s32.totalorder %s923_s13, %s5464_s25  ;;  %p5472_p4 = scmp.lt.s32.totalorder %s923_s13, %s923_s13 }
  0xee   : > { %p5473_p5 = scmp.lt.s32.totalorder %s5471_s9, %s5464_s25 }
  0xef   : > { %p5467_p1 = pnand %p5465_p2, %p6010_p7 }
  0xf0   : > { %p5474_p8 = por %p5473_p5, %p5472_p4 }
  0xf1   : > { %p5468_p3 = pneg %p5467_p1 }
  0xf3   : > { %p5475_p9 = pnand %p5474_p8, %p5468_p3 }
  0xf5   : > { %5478 = shalt.err (!%p5475_p9)
}
  0xf6   : > { %4912 = dma.hbm_to_vmem [thread:$0]  (!%p6002_p6), %s5900_s21, 16, %s923_s13, [#allocation18]  }
  0xf7   : > { %s5490_s6 = scalar_lea.vmem %s947_s11, 16  ;;  %s5497_s8 = scalar_lea.vmem %s947_s11, 32 }
  0xf8   : > { %p5491_p10 = scmp.ne.s32.totalorder %s947_s11, %s5490_s6  ;;  %p5498_p13 = scmp.lt.s32.totalorder %s947_s11, %s947_s11 }
  0xf9   : > { %p5499_p0 = scmp.lt.s32.totalorder %s5497_s8, %s5490_s6 }
  0xfa   : > { %p5493_p11 = pnand %p5491_p10, %p6010_p7 }
  0xfb   : > { %p5500_p2 = por %p5499_p0, %p5498_p13 }
  0xfc   : > { %p5494_p12 = pneg %p5493_p11 }
  0xfe   : > { %p5501_p1 = pnand %p5500_p2, %p5494_p12 }
 0x100   : > { %5504 = shalt.err (!%p5501_p1)
}
 0x101   : > { %s6661_s1 = sld [smem:[#allocation62_spill]]  ;;  %s5791_s15 = smov [#allocation25]  }
 0x102   : > { %s968_s10 = sshll.u32 %s5791_s15, 4  ;;  %s5792_s4 = smov [#allocation28]   ;;  %s969_s10 = int_to_ptr.vmem [resolvable:$true] %s968_s10 }
 0x103   : > { %s990_s13 = sshll.u32 %s5792_s4, 4  ;;  %s5516_s16 = scalar_lea.vmem %s969_s10, 16  ;;  %s991_s13 = int_to_ptr.vmem [resolvable:$true] %s990_s13 }
 0x104   : > { %p5517_p3 = scmp.ne.s32.totalorder %s969_s10, %s5516_s16  ;;  %s5523_s25 = scalar_lea.vmem %s969_s10, 32 }
 0x105   : > { %p5524_p8 = scmp.lt.s32.totalorder %s969_s10, %s969_s10  ;;  %p5525_p9 = scmp.lt.s32.totalorder %s5523_s25, %s5516_s16 }
 0x106   : > { %p5519_p4 = pnand %p5517_p3, %p6010_p7 }
 0x107   : > { %4918 = dma.hbm_to_vmem [thread:$0]  (!%p6002_p6), %s6661_s1, 16, %s947_s11, [#allocation21]  }
 0x108   : > { %p5520_p5 = pneg %p5519_p4  ;;  %p5526_p10 = por %p5525_p9, %p5524_p8 }
 0x10a   : > { %p5527_p11 = pnand %p5526_p10, %p5520_p5 }
 0x10c   : > { %5530 = shalt.err (!%p5527_p11)
}
 0x10d   : > { %s6662_s9 = sld [smem:[#allocation63_spill]]  ;;  %s5542_s11 = scalar_lea.vmem %s991_s13, 16 }
 0x10e   : > { %p5543_p12 = scmp.ne.s32.totalorder %s991_s13, %s5542_s11  ;;  %s5549_s6 = scalar_lea.vmem %s991_s13, 32 }
 0x10f   : > { %p5550_p2 = scmp.lt.s32.totalorder %s991_s13, %s991_s13  ;;  %p5551_p1 = scmp.lt.s32.totalorder %s5549_s6, %s5542_s11 }
 0x110   : > { %p5545_p13 = pnand %p5543_p12, %p6010_p7 }
 0x111   : > { %p5552_p3 = por %p5551_p1, %p5550_p2 }
 0x112   : > { %p5546_p0 = pneg %p5545_p13 }
 0x113   : > { %4924 = dma.hbm_to_vmem [thread:$0]  (!%p6002_p6), %s6662_s9, 16, %s969_s10, [#allocation24]  }
 0x114   : > { %p5553_p4 = pnand %p5552_p3, %p5546_p0 }
 0x116   : > { %5556 = shalt.err (!%p5553_p4)
}
 0x117   : > { %s6663_s8 = sld [smem:[#allocation65_spill]]  ;;  %s5793_s1 = smov [#allocation31]  }
 0x118   : > { %s1020_s15 = sshll.u32 %s5793_s1, 4  ;;  %s5794_s10 = smov [#allocation32]   ;;  %s1021_s15 = int_to_ptr.vmem [resolvable:$true] %s1020_s15 }
 0x119   : > { %s1034_s4 = sshll.u32 %s5794_s10, 4  ;;  %s5568_s16 = scalar_lea.vmem %s1021_s15, 16  ;;  %s1035_s4 = int_to_ptr.vmem [resolvable:$true] %s1034_s4 }
 0x11a   : > { %p5569_p5 = scmp.ne.s32.totalorder %s1021_s15, %s5568_s16  ;;  %s5575_s25 = scalar_lea.vmem %s1021_s15, 32 }
 0x11b   : > { %p5576_p10 = scmp.lt.s32.totalorder %s1021_s15, %s1021_s15  ;;  %p5577_p11 = scmp.lt.s32.totalorder %s5575_s25, %s5568_s16 }
 0x11c   : > { %p5571_p8 = pnand %p5569_p5, %p6010_p7 }
 0x11d   : > { %4930 = dma.hbm_to_vmem [thread:$0]  (!%p6002_p6), %s6663_s8, 16, %s991_s13, [#allocation27]  }
 0x11e   : > { %p5572_p9 = pneg %p5571_p8  ;;  %p5578_p12 = por %p5577_p11, %p5576_p10 }
 0x120   : > { %p5579_p13 = pnand %p5578_p12, %p5572_p9 }
 0x122   : > { %5582 = shalt.err (!%p5579_p13)
}
 0x123   : > { %4936 = dma.hbm_to_vmem [thread:$0]  (!%p6002_p6), %s5950_s29, 16, %s1021_s15, [#allocation30]  }
 0x124   : > { %s5594_s13 = scalar_lea.vmem %s1035_s4, 16  ;;  %s5601_s9 = scalar_lea.vmem %s1035_s4, 32 }
 0x125   : > { %p5595_p0 = scmp.ne.s32.totalorder %s1035_s4, %s5594_s13  ;;  %p5602_p3 = scmp.lt.s32.totalorder %s1035_s4, %s1035_s4 }
 0x126   : > { %p5603_p4 = scmp.lt.s32.totalorder %s5601_s9, %s5594_s13 }
 0x127   : > { %p5597_p2 = pnand %p5595_p0, %p6010_p7 }
 0x128   : > { %p5604_p5 = por %p5603_p4, %p5602_p3 }
 0x129   : > { %p5598_p1 = pneg %p5597_p2 }
 0x12b   : > { %p5605_p8 = pnand %p5604_p5, %p5598_p1 }
 0x12d   : > { %5608 = shalt.err (!%p5605_p8)
}
 0x12e   : > { %s6664_s5 = sld [smem:[#allocation69_spill]]  ;;  %s4327_s28 = sadd.s32 4294967294, %s5741_s26  }
 0x12f   : > { %s6131_s11 = sadd.s32 1, %s5741_s26   ;;  %s96_s18 = sadd.s32 1, %s5737_s0 }
 0x130   : > { %s93_s6 = ssub.s32 %s5741_s26, %s6131_s11  ;;  %s6665_s8 = sld [smem:[#allocation47_spill]] }
 0x131   : > { %p103_p7 = scmp.ne.s32.totalorder %s5737_s0, %s5733_s23  ;;  %p94_p9 = scmp.eq.s32.totalorder %s93_s6, 0 }
 0x132   : > { %p104_p10 = scmp.eq.s32.totalorder %s5741_s26, 0  ;;  %p109_p11 = scmp.ne.s32.totalorder %s5733_s23, %s5729_s22 }
 0x133   : > { %p773_p12 = scmp.eq.s32.totalorder %s5988_s2, 1  ;;  %p6666_p0 = scmp.eq.s32.totalorder %s5988_s2, 0 }
 0x134   : > { %4939 = dma.hbm_to_vmem [thread:$0]  (!%p6002_p6), %s6664_s5, 16, %s1035_s4, [#allocation33]  }
 0x135   : > { %s6143_s1 = scalar_select %p94_p9, %s5737_s0, %s96_s18  }
 0x136   : > { %p105_p13 = por %p104_p10, %p103_p7  ;;  %p6147_p2 = por %p6666_p0, %p109_p11 }
 0x137   : > { %p6151_p6 = por %p773_p12, %p103_p7  ;;  %p779_p1 = scmp.eq.s32.totalorder %s4327_s28, 1 }
 0x138   : > { %s6667_s15 = scalar_select %p6147_p2, 1, 0 }
 0x139   : > { %s6668_s10 = scalar_select %p6151_p6, 1, 0 }
 0x13a   : > { %p4967_p3 = scmp.lt.s32.totalorder %s5741_s26, 2  ;;  %s1045_s4 = sand.u32 1, %s5737_s0  }
 0x13b   : > { %p6157_p4 = por %p779_p1, %p109_p11  ;;  %s4349_s25 = sshll.u32 %s1045_s4, 3 }
 0x13c   : > { %s4350_s13 = sshll.u32 %s5741_s26, 7  ;;  %s1049_s18 = scalar_lea.vmem [#allocation2], %s4349_s25 }
 0x13d   : > { %s6669_s16 = scalar_select %p6157_p4, 1, 0 }
 0x13e   : > { %s6163_s9 = scalar_lea.hbm %s6665_s8, %s4350_s13  ;;  %s1056_s6 = sshll.u32 %s1049_s18, 4  ;;  %s1057_s6 = int_to_ptr.vmem [resolvable:$true] %s1056_s6 }
 0x13f   : > { %p6165_p5 = pnand %p4967_p3, %p105_p13  ;;  %s1046_s28 = scalar_lea.sflag [#allocation3], %s1045_s4 }
 0x140   : > { %s5609_s5 = scalar_lea.hbm %s6163_s9, 128  ;;  %s5614_s13 = scalar_lea.hbm %s6665_s8, 256 }
 0x141   : > { %s6670_s3 = scalar_select %p6165_p5, 1, 0 }
 0x142   : > { %p5610_p8 = scmp.ne.s32.totalorder %s6163_s9, %s5609_s5  ;;  %p5611_p7 = pneg %p6165_p5 }
 0x143   : > { %p5615_p11 = scmp.lt.s32.totalorder %s6163_s9, %s6665_s8  ;;  %p5616_p12 = scmp.lt.s32.totalorder %s5614_s13, %s5609_s5 }
 0x144   : > { %p5612_p9 = pnand %p5611_p7, %p5610_p8 }
 0x145   : > { %p5617_p0 = por %p5616_p12, %p5615_p11 }
 0x146   : > { %p5613_p10 = pneg %p5612_p9 }
 0x148   : > { %p5618_p1 = pnand %p5617_p0, %p5613_p10 }
 0x14a   : > { %5621 = shalt.err (!%p5618_p1)
}
 0x14b   : > { %s5622_s25 = scalar_lea.vmem %s1057_s6, 128  ;;  %s5795_s18 = smov [#allocation2]  }
 0x14c   : > { %p5623_p13 = scmp.ne.s32.totalorder %s1057_s6, %s5622_s25  ;;  %s5627_s12 = sshll.u32 %s5795_s18, 4  ;;  %s5628_s12 = int_to_ptr.vmem [resolvable:$false] %s5627_s12 }
 0x14d   : > { %s5629_s4 = scalar_lea.vmem %s5628_s12, 256  ;;  %p5630_p6 = scmp.lt.s32.totalorder %s1057_s6, %s5628_s12 }
 0x14e   : > { %p5625_p3 = pnand %p5623_p13, %p5611_p7  ;;  %p5631_p2 = scmp.lt.s32.totalorder %s5629_s4, %s5622_s25 }
 0x150   : > { %p5626_p4 = pneg %p5625_p3  ;;  %p5632_p5 = por %p5631_p2, %p5630_p6 }
 0x152   : > { %p5633_p8 = pnand %p5632_p5, %p5626_p4 }
 0x154   : > { %5636 = shalt.err (!%p5633_p8)
}
 0x155   : > { %p6671_p9 = scmp.ne.s32.totalorder %s6670_s3, 0  ;;  %p6672_p10 = scmp.ne.s32.totalorder %s6649_s7, 0 }
 0x156   : > { %s6182_s5 = sand.u32 (!%p6672_p10), 1, %s5733_s23   ;;  %p6673_p2 = scmp.ne.s32.totalorder (!%p6672_p10), %s6667_s15, 0 }
 0x157   : > { %4943 = dma.hbm_to_vmem [thread:$0]  (!%p6671_p9), %s6163_s9, 128, %s1057_s6, %s1046_s28  }
 0x158   : > { %1081 = sbr.rel (%p6672_p10) target bundleno = 6278 (0x1886), region = 144  ;;  %s6620_s13 = sshll.u32 (!%p6672_p10), %s6182_s5, 3 }
 0x159   : > { %s1084_s12 = scalar_lea.sflag (!%p6672_p10), [#allocation3], %s6182_s5  ;;  %s6188_s25 = scalar_lea.vmem (!%p6672_p10), [#allocation2], %s6620_s13 }
 0x15d   : > { %5680 = dma.done.wait (%p6673_p2), %s1084_s12, 128  }
 0x15e   : > { %5682 = vsyncadd (%p6673_p2), %s1084_s12, 4294967168  ;;  %p6674_p6 = scmp.eq.s32.totalorder %s5988_s2, 0 }
 0x160   : > { %5684 = dma.done.wait (%p6674_p6), [#allocation6], 32   ;;  %p6675_p4 = pmov %p6674_p6 }
 0x162   : > { %5686 = vsyncadd (%p6675_p4), [#allocation6], 4294967264  ;;  %p6676_p5 = pmov %p6675_p4 }
 0x163   : > { %p6677_p7 = pmov %p6675_p4 }
 0x164   : > { %5688 = dma.done.wait (%p6676_p5), [#allocation9], 32  }
 0x165   : > { %5690 = vsyncadd (%p6677_p7), [#allocation9], 4294967264  ;;  %p6678_p11 = pmov %p6675_p4 }
 0x166   : > { %p6679_p12 = pmov %p6675_p4 }
 0x167   : > { %5692 = dma.done.wait (%p6678_p11), [#allocation12], 1024  }
 0x168   : > { %5694 = vsyncadd (%p6679_p12), [#allocation12], 4294966272  ;;  %p6680_p0 = pmov %p6675_p4 }
 0x16a   : > { %5696 = dma.done.wait (%p6680_p0), [#allocation15], 528   ;;  %p6681_p1 = pmov %p6680_p0 }
 0x16b   : > { %p6682_p13 = pmov %p6680_p0 }
 0x16c   : > { %5698 = vsyncadd (%p6681_p1), [#allocation15], 4294966768 }
 0x16d   : > { %5700 = dma.done.wait (%p6682_p13), [#allocation18], 32   ;;  %p6683_p3 = pmov %p6680_p0 }
 0x16e   : > { %p6684_p8 = pmov %p6680_p0 }
 0x16f   : > { %5702 = vsyncadd (%p6683_p3), [#allocation18], 4294967264 }
 0x170   : > { %5704 = dma.done.wait (%p6684_p8), [#allocation21], 528   ;;  %p6685_p9 = pmov %p6680_p0 }
 0x171   : > { %p6686_p10 = pmov %p6680_p0 }
 0x172   : > { %5706 = vsyncadd (%p6685_p9), [#allocation21], 4294966768 }
 0x173   : > { %5708 = dma.done.wait (%p6686_p10), [#allocation24], 32   ;;  %p6687_p2 = pmov %p6680_p0 }
 0x174   : > { %p6688_p6 = pmov %p6680_p0 }
 0x175   : > { %5710 = vsyncadd (%p6687_p2), [#allocation24], 4294967264 }
 0x176   : > { %5712 = dma.done.wait (%p6688_p6), [#allocation27], 32   ;;  %p6689_p4 = pmov %p6680_p0 }
 0x177   : > { %p6690_p5 = pmov %p6680_p0 }
 0x178   : > { %5714 = vsyncadd (%p6689_p4), [#allocation27], 4294967264 }
 0x179   : > { %5716 = dma.done.wait (%p6690_p5), [#allocation30], 528   ;;  %p6691_p7 = pmov %p6680_p0 }
 0x17a   : > { %p6692_p11 = pmov %p6680_p0 }
 0x17b   : > { %5718 = vsyncadd (%p6691_p7), [#allocation30], 4294966768 }
 0x17c   : > { %5720 = dma.done.wait (%p6692_p11), [#allocation33], 16   ;;  %p6693_p12 = pmov %p6680_p0 }
 0x17d   : > { %s6694_s3 = sld [smem:[#allocation52_spill]]  ;;  %v5796_v0 = vmov 0.0   ;;  %vm5797_vm0 = vmmov 0   ;;  %v6247_v5 = vld [vmem:[%s6188_s25] sm:$0xff]  ;;  %vm1279_vm1 = vcmask 261120   ;;  %vm1520_vm2 = vcmask 64512  }
 0x17e   : > { %5722 = vsyncadd (%p6693_p12), [#allocation33], 4294967280  ;;  %4554 = vmatprep.subr.mxu0 %v5796_v0  ;;  %s6695_s7 = sld [smem:[#allocation53_spill]]  ;;  %4562 = vmatprep.mubr.msk.f32.mxu0 %vm5797_vm0, %v5796_v0  ;;  %v4377_v16 = vld [vmem:[#allocation5] ss:$0 sm:$0xff]  ;;  %s5798_s9 = smov 120  }
 0x17f   : > { %4592 = vmatprep.subr.mxu1 %v5796_v0  ;;  %4594 = vmatprep.mubr.msk.f32.mxu1 %vm5797_vm0, %v5796_v0  ;;  %s6696_s15 = sld [smem:[#allocation54_spill]]  ;;  %v4379_v17 = vld [vmem:[#allocation7] ss:$0 sm:$0xff]  ;;  %v4381_v23 = vld [vmem:[#allocation8] ss:$0 sm:$0xff]  ;;  %s5799_s28 = smov 112  }
 0x180   : > { %s6697_s6 = sld [smem:[#allocation50_spill]]  ;;  %s5800_s4 = smov 104   ;;  %vm2863_vm3 = vcmask 130048  }
 0x181   : > { %s6698_s18 = sld [smem:[#allocation57_spill]]  ;;  %p1252_p0 = scmp.lt.s32.totalorder %s5988_s2, 1 }
 0x182   : > { %s6699_s12 = sld [smem:[#allocation49_spill]]  ;;  %s4008_s8 = scalar_lea.sflag [#allocation4], %s6182_s5 }
 0x183   : > { %v1271_v1 = vld [vmem:[%s6694_s3 + $0x18] sm:$0xff]  ;;  %v1270_v2 = vld [vmem:[%s6694_s3 + $0x10] sm:$0xff]  ;;  %v1269_v3 = vld [vmem:[%s6694_s3 + $0x8] sm:$0xff]  ;;  %s6379_s25 = scalar_select %p1252_p0, %s5988_s2, 1 }
 0x184   : > { %4555 = vmatpush3.msra.mxu0 %v1271_v1  ;;  %v1268_v4 = vld [vmem:[%s6694_s3] sm:$0xff]  ;;  %v1357_v6 = vld [vmem:[%s6695_s7 + $0x18] sm:$0xff]  ;;  %v1356_v7 = vld [vmem:[%s6695_s7 + $0x10] sm:$0xff]  ;;  %p6707_p13 = scmp.ne.s32.totalorder %s6668_s10, 0  ;;  %s5801_s14 = smov [#allocation34]  }
 0x185   : > { %4556 = vmatprep.subr.mxu0 %v5796_v0  ;;  %v1355_v8 = vld [vmem:[%s6695_s7 + $0x8] sm:$0xff]  ;;  %v1354_v9 = vld [vmem:[%s6695_s7] sm:$0xff]  ;;  %v1438_v10 = vld [vmem:[%s6696_s15 + $0x18] sm:$0xff] }
 0x186   : > { %4557 = vmatpush3.msra.mxu0 %v1270_v2  ;;  %v1437_v11 = vld [vmem:[%s6696_s15 + $0x10] sm:$0xff]  ;;  %v1436_v12 = vld [vmem:[%s6696_s15 + $0x8] sm:$0xff]  ;;  %v1435_v13 = vld [vmem:[%s6696_s15] sm:$0xff] }
 0x187   : > { %4558 = vmatprep.subr.mxu0 %v5796_v0  ;;  %v6304_v29 = vld [vmem:[%s6697_s6] sm:$0xff]  ;;  %v1517_v51 = vld [vmem:[%s6698_s18 + $0x8] sm:$0xff]  ;;  %s4442_s6 = sshll.u32 %s6379_s25, 4  ;;  %s6701_s25 = sld [smem:[#allocation51_spill]] }
 0x188   : > { %4559 = vmatpush3.msra.mxu0 %v1269_v3  ;;  %v1516_v56 = vld [vmem:[%s6698_s18] sm:$0xff]  ;;  %s1261_s13 = scalar_lea.vmem %s6699_s12, %s4442_s6 }
 0x189   : > { %4560 = vmatprep.subr.mxu0 %v5796_v0 }
 0x18a   : > { %4561 = vmatpush3.msra.mxu0 %v1268_v4 }
 0x18b   : > { %4563 = vmatmul.mubr.msk.f32.vlgmr.msra.gmra.mxu0 %vm1279_vm1, %v6247_v5  ;;  %4565 = vmatprep.subr.mxu0 %v5796_v0 }
 0x18c   : > { %4566 = vmatpush3.msra.mxu0 %v1357_v6  ;;  %4573 = vmatprep.mubr.msk.f32.mxu0 %vm5797_vm0, %v5796_v0 }
 0x18d   : > { %4567 = vmatprep.subr.mxu0 %v5796_v0 }
 0x18e   : > { %4568 = vmatpush3.msra.mxu0 %v1356_v7 }
 0x18f   : > { %4569 = vmatprep.subr.mxu0 %v5796_v0 }
 0x190   : > { %4570 = vmatpush3.msra.mxu0 %v1355_v8 }
 0x191   : > { %4571 = vmatprep.subr.mxu0 %v5796_v0 }
 0x192   : > { %4572 = vmatpush3.msra.mxu0 %v1354_v9 }
 0x193   : > { %4574 = vmatmul.mubr.msk.f32.vlgmr.msra.gmra.mxu0 %vm1279_vm1, %v6247_v5  ;;  %4576 = vmatprep.subr.mxu0 %v5796_v0 }
 0x194   : > { %4584 = vmatprep.mubr.msk.f32.mxu0 %vm5797_vm0, %v5796_v0  ;;  %4577 = vmatpush3.msra.mxu0 %v1438_v10 }
 0x195   : > { %4578 = vmatprep.subr.mxu0 %v5796_v0 }
 0x196   : > { %4579 = vmatpush3.msra.mxu0 %v1437_v11 }
 0x197   : > { %4580 = vmatprep.subr.mxu0 %v5796_v0 }
 0x198   : > { %4581 = vmatpush3.msra.mxu0 %v1436_v12 }
 0x199   : > { %4582 = vmatprep.subr.mxu0 %v5796_v0 }
 0x19a   : > { %4583 = vmatpush3.msra.mxu0 %v1435_v13 }
 0x19b   : > { %4585 = vmatmul.mubr.msk.f32.vlgmr.msra.gmra.mxu0 %vm1279_vm1, %v6247_v5  ;;  %4587 = vmatprep.subr.mxu0 %v5796_v0 }
 0x19c   : > { %4589 = vmatprep.mubr.msk.f32.mxu0 %vm5797_vm0, %v5796_v0 }
 0x24b   : > { %v1349_v14 = vpop.f32.mrf.mxu0 }
 0x24c   : > { %v1350_v18 = vadd.f32 %v4377_v16, %v1349_v14 }
 0x24d   : > { %v4564_v15 = vpop.f32.mrf.mxu0 }
 0x24e   : > { %v6285_v22 = vmul.f32 0.35355338, %v1350_v18 }
 0x253   : > { %v1431_v19 = vpop.f32.mrf.mxu0 }
 0x254   : > { %v6279_v20 = vadd.f32 %v4379_v17, %v1431_v19 }
 0x255   : > { %v4575_v21 = vpop.f32.mrf.mxu0 }
 0x256   : > { %1683 = vrot.lane.b32.xlu0 %v6279_v20, %s5798_s9  ;;  %4588 = vmatpush3.xpose.msk.msra.mxu0 %vm1520_vm2, %v6279_v20 }
 0x257   : > { %4597 = vmatprep.subr.mxu0 %v5796_v0 }
 0x259   : > { %4590 = vmatmul.mubr.msk.f32.vlgmr.msra.gmra.mxu0 %vm1520_vm2, %v6285_v22 }
 0x25a   : > { %1681 = vrot.lane.b32.xlu0 %v6285_v22, %s5798_s9  ;;  %4599 = vmatprep.mubr.msk.f32.mxu0 %vm5797_vm0, %v5796_v0 }
 0x25b   : > { %v1512_v24 = vpop.f32.mrf.mxu0 }
 0x25c   : > { %v6294_v25 = vadd.f32 %v4381_v23, %v1512_v24 }
 0x25d   : > { %v4586_v26 = vpop.f32.mrf.mxu0 }
 0x25e   : > { %4593 = vmatpush3.msra.mxu1 %v6294_v25 }
 0x25f   : > { %4602 = vmatprep.subr.mxu1 %v5796_v0 }
 0x2c8   : > { %v1684_v27 = vpop.permute.xlu0 %1683 }
 0x2c9   : > { %4598 = vmatpush3.xpose.msk.msra.mxu0 %vm1520_vm2, %v1684_v27 }
 0x2ca   : > { %4607 = vmatprep.subr.mxu0 %v5796_v0 }
 0x2cc   : > { %v1682_v28 = vpop.permute.xlu0 %1681 }
 0x2cd   : > { %4600 = vmatmul.mubr.msk.f32.vlgmr.msra.gmra.mxu0 %vm1520_vm2, %v1682_v28 }
 0x2ce   : > { %4609 = vmatprep.mubr.msk.f32.mxu0 %vm5797_vm0, %v5796_v0  ;;  %4608 = vmatpush3.msra.mxu0 %v1517_v51 }
 0x2cf   : > { %4617 = vmatprep.subr.mxu0 %v5796_v0 }
 0x319   : > { %v1593_v30 = vpop.f32.mrf.mxu0 }
 0x31a   : > { %v1594_v31 = vadd.f32 %v1593_v30, %v6304_v29 }
 0x31b   : > { %v4591_v32 = vpop.f32.mrf.mxu0 }
 0x31c   : > { %v1597_v33 = vsel %vm1520_vm2, %v1594_v31, -inf }
 0x31d   : > { %1598 = vmax.xlane.f32.xlu1 %v1597_v33 }
 0x38d   : > { %v1755_v34 = vpop.f32.mrf.mxu0 }
 0x38e   : > { %v1756_v35 = vadd.f32 %v1755_v34, %v6304_v29  ;;  %v1519_v34 = vld [vmem:[%s6698_s18 + $0x18] sm:$0xff] }
 0x38f   : > { %v4601_v36 = vpop.f32.mrf.mxu0 }
 0x390   : > { %v1759_v37 = vsel %vm1520_vm2, %v1756_v35, -inf }
 0x391   : > { %1760 = vmax.xlane.f32.xlu1 %v1759_v37 }
 0x3a6   : > { %v1599_v38 = vpop.xlane.xlu1 %1598 }
 0x3a7   : > { %v1600_v39 = vsub.f32 %v1594_v31, %v1599_v38 }
 0x3a9   : > { %v1601_v40 = vmul.f32 1.442695, %v1600_v39 }
 0x3ab   : > { %5077 = vpow2.f32 %v1601_v40 }
 0x3b8   : > { %v5078_v41 = vpop.eup %5077 }
 0x3b9   : > { %v1603_v42 = vsel %vm1520_vm2, %v5078_v41, 0.0 }
 0x3ba   : > { %1604 = vadd.xlane.f32.xlu0 %v1603_v42 }
 0x3d0   : > { %2082 = vrot.lane.b32.xlu0 %v6294_v25, %s5799_s28 }
 0x41a   : > { %v1761_v43 = vpop.xlane.xlu1 %1760 }
 0x41b   : > { %v1762_v44 = vsub.f32 %v1756_v35, %v1761_v43 }
 0x41d   : > { %v1763_v45 = vmul.f32 1.442695, %v1762_v44  ;;  %v4399_v44 = vld [vmem:[#allocation10] ss:$0 sm:$0xff] }
 0x41f   : > { %5079 = vpow2.f32 %v1763_v45 }
 0x42c   : > { %v5080_v46 = vpop.eup %5079 }
 0x42d   : > { %v1765_v47 = vsel %vm1520_vm2, %v5080_v46, 0.0 }
 0x42e   : > { %1766 = vadd.xlane.f32.xlu1 %v1765_v47 }
 0x43f   : > { %1771 = vrot.lane.b32.xlu1 %v6294_v25, %s5798_s9 }
 0x443   : > { %v1605_v48 = vpop.xlane.xlu0 %1604  ;;  %1995 = vrot.lane.b32.xlu1 %v6279_v20, %s5799_s28 }
 0x444   : > { %5081 = vrcp.f32 %v1605_v48 }
 0x447   : > { %1993 = vrot.lane.b32.xlu1 %v6285_v22, %s5799_s28  ;;  %v2083_v58 = vpop.permute.xlu0 %2082 }
 0x451   : > { %v5082_v49 = vpop.eup %5081 }
 0x452   : > { %v1607_v50 = vmul.f32 %v5082_v49, %v5078_v41 }
 0x454   : > { %4595 = vmatmul.mubr.msk.f32.vlgmr.msra.gmra.mxu1 %vm1520_vm2, %v1607_v50 }
 0x455   : > { %4604 = vmatprep.mubr.msk.f32.mxu1 %vm5797_vm0, %v5796_v0 }
 0x4b7   : > { %v1767_v52 = vpop.xlane.xlu1 %1766 }
 0x4b8   : > { %5083 = vrcp.f32 %v1767_v52 }
 0x4bb   : > { %v1772_v53 = vpop.permute.xlu1 %1771 }
 0x4bc   : > { %4603 = vmatpush3.msra.mxu1 %v1772_v53 }
 0x4bd   : > { %4612 = vmatprep.subr.mxu1 %v5796_v0 }
 0x4bf   : > { %v1996_v60 = vpop.permute.xlu1 %1995 }
 0x4c3   : > { %v1994_v63 = vpop.permute.xlu1 %1993 }
 0x4c5   : > { %v5084_v54 = vpop.eup %5083 }
 0x4c6   : > { %v1769_v55 = vmul.f32 %v5084_v54, %v5080_v46 }
 0x4c8   : > { %4605 = vmatmul.mubr.msk.f32.vlgmr.msra.gmra.mxu1 %vm1520_vm2, %v1769_v55  ;;  %v2599_v55 = vld [vmem:[#allocation13 + $0x18] sm:$0xff] }
 0x4c9   : > { %4613 = vmatpush3.msra.mxu1 %v1516_v56  ;;  %4614 = vmatprep.mubr.msk.f32.mxu1 %vm5797_vm0, %v5796_v0  ;;  %v2598_v56 = vld [vmem:[#allocation13 + $0x10] sm:$0xff] }
 0x4ca   : > { %4622 = vmatprep.subr.mxu1 %v5796_v0 }
 0x514   : > { %v1677_v57 = vpop.f32.mrf.mxu1 }
 0x515   : > { %4615 = vmatmul.mubr.msk.f32.vlgmr.msra.gmra.mxu1 %vm1520_vm2, %v1677_v57  ;;  %v2596_v57 = vld [vmem:[#allocation13] sm:$0xff] }
 0x516   : > { %4623 = vmatpush3.msra.mxu1 %v2083_v58  ;;  %v4596_v59 = vpop.f32.mrf.mxu1  ;;  %4624 = vmatprep.mubr.msk.f32.mxu1 %vm5797_vm0, %v5796_v0  ;;  %v1263_v58 = vld [vmem:[%s1261_s13] sm:$0xff] }
 0x517   : > { %4632 = vmatprep.subr.mxu1 %v5796_v0  ;;  %v1264_v59 = vld [vmem:[%s1261_s13 + $0x8] sm:$0xff]  ;;  %s6700_s13 = sld [smem:[#allocation48_spill]] }
 0x51d   : > { %s1256_s12 = scalar_lea.vmem %s6700_s13, %s4442_s6  ;;  %s6705_s6 = sld [smem:[#allocation70_spill]] }
 0x51e   : > { %s4439_s13 = sshll.u32 %s5988_s2, 7 }
 0x523   : > { %s4019_s7 = scalar_lea.hbm %s6705_s6, %s4439_s13 }
 0x588   : > { %v1843_v61 = vpop.f32.mrf.mxu1 }
 0x589   : > { %4610 = vmatmul.mubr.msk.f32.vlgmr.msra.gmra.mxu0 %vm1520_vm2, %v1843_v61  ;;  %v2513_v61 = vld [vmem:[#allocation11 + $0x10] sm:$0xff] }
 0x58a   : > { %4618 = vmatpush3.xpose.msk.msra.mxu0 %vm1520_vm2, %v1996_v60  ;;  %v4606_v62 = vpop.f32.mrf.mxu1  ;;  %4619 = vmatprep.mubr.msk.f32.mxu0 %vm5797_vm0, %v5796_v0  ;;  %v2514_v60 = vld [vmem:[#allocation11 + $0x18] sm:$0xff] }
 0x58b   : > { %4627 = vmatprep.subr.mxu0 %v5796_v0  ;;  %v2512_v62 = vld [vmem:[#allocation11 + $0x8] sm:$0xff] }
 0x58d   : > { %4620 = vmatmul.mubr.msk.f32.vlgmr.msra.gmra.mxu0 %vm1520_vm2, %v1994_v63  ;;  %v2511_v63 = vld [vmem:[#allocation11] sm:$0xff] }
 0x58e   : > { %4629 = vmatprep.mubr.msk.f32.mxu0 %vm5797_vm0, %v5796_v0 }
 0x5d5   : > { %v1989_v1 = vpop.f32.mrf.mxu1 }
 0x5d7   : > { %v4616_v2 = vpop.f32.mrf.mxu1 }
 0x649   : > { %v1916_v3 = vpop.f32.mrf.mxu0 }
 0x64a   : > { %v1990_v35 = vadd.f32 %v1989_v1, %v1916_v3 }
 0x64b   : > { %v4611_v4 = vpop.f32.mrf.mxu0 }
 0x64d   : > { %v2067_v6 = vpop.f32.mrf.mxu0 }
 0x64e   : > { %v2068_v7 = vadd.f32 %v2067_v6, %v6304_v29  ;;  %v4400_v6 = vld [vmem:[#allocation23] ss:$0 sm:$0xff] }
 0x64f   : > { %v4621_v8 = vpop.f32.mrf.mxu0 }
 0x650   : > { %v2071_v9 = vsel %vm1520_vm2, %v2068_v7, -inf  ;;  %v4401_v8 = vld [vmem:[#allocation25] ss:$0 sm:$0xff] }
 0x651   : > { %2072 = vmax.xlane.f32.xlu1 %v2071_v9 }
 0x6da   : > { %v2073_v10 = vpop.xlane.xlu1 %2072 }
 0x6db   : > { %v2074_v11 = vsub.f32 %v2068_v7, %v2073_v10 }
 0x6dd   : > { %v2075_v12 = vmul.f32 1.442695, %v2074_v11  ;;  %v4404_v11 = vld [vmem:[#allocation17] ss:$0 sm:$0xff] }
 0x6df   : > { %5085 = vpow2.f32 %v2075_v12 }
 0x6ec   : > { %v5086_v13 = vpop.eup %5085 }
 0x6ed   : > { %v2077_v14 = vsel %vm1520_vm2, %v5086_v13, 0.0 }
 0x6ee   : > { %2078 = vadd.xlane.f32.xlu0 %v2077_v14 }
 0x704   : > { %2234 = vrot.lane.b32.xlu0 %v6279_v20, %s5800_s4  ;;  %v1518_v20 = vld [vmem:[%s6698_s18 + $0x10] sm:$0xff] }
 0x705   : > { %4628 = vmatpush3.msra.mxu0 %v1518_v20  ;;  %v2688_v20 = vld [vmem:[#allocation14] sm:$0xff] }
 0x706   : > { %4637 = vmatprep.subr.mxu0 %v5796_v0 }
 0x708   : > { %2232 = vrot.lane.b32.xlu0 %v6285_v22, %s5800_s4 }
 0x777   : > { %v2079_v15 = vpop.xlane.xlu0 %2078 }
 0x778   : > { %5087 = vrcp.f32 %v2079_v15 }
 0x77b   : > { %v2235_v17 = vpop.permute.xlu0 %2234 }
 0x77f   : > { %v2233_v19 = vpop.permute.xlu0 %2232 }
 0x785   : > { %v5088_v16 = vpop.eup %5087 }
 0x786   : > { %v2081_v18 = vmul.f32 %v5088_v16, %v5086_v13  ;;  %v2691_v16 = vld [vmem:[#allocation14 + $0x18] sm:$0xff] }
 0x788   : > { %4625 = vmatmul.mubr.msk.f32.vlgmr.msra.gmra.mxu1 %vm1520_vm2, %v2081_v18  ;;  %v1265_v18 = vld [vmem:[%s1256_s12] sm:$0xff] }
 0x789   : > { %4633 = vmatpush3.xpose.msk.msra.mxu1 %vm1520_vm2, %v2235_v17  ;;  %4634 = vmatprep.mubr.msk.f32.mxu1 %vm5797_vm0, %v5796_v0  ;;  %v2690_v17 = vld [vmem:[#allocation14 + $0x10] sm:$0xff] }
 0x78a   : > { %4642 = vmatprep.subr.mxu1 %v5796_v0 }
 0x78c   : > { %4635 = vmatmul.mubr.msk.f32.vlgmr.msra.gmra.mxu1 %vm1520_vm2, %v2233_v19  ;;  %v2689_v19 = vld [vmem:[#allocation14 + $0x8] sm:$0xff] }
 0x78d   : > { %4644 = vmatprep.mubr.msk.f32.mxu1 %vm5797_vm0, %v5796_v0  ;;  %4643 = vmatpush3.msra.mxu1 %v1519_v34 }
 0x78e   : > { %4658 = vmatprep.subr.mxu1 %v2599_v55 }
 0x848   : > { %v2154_v21 = vpop.f32.mrf.mxu1 }
 0x849   : > { %4630 = vmatmul.mubr.msk.f32.vlgmr.msra.gmra.mxu0 %vm1520_vm2, %v2154_v21  ;;  %v4402_v21 = vld [vmem:[#allocation16] ss:$0 sm:$0xff] }
 0x84a   : > { %v4626_v22 = vpop.f32.mrf.mxu1  ;;  %4639 = vmatprep.mubr.msk.f32.mxu0 %vm5797_vm0, %v5796_v0 }
 0x84b   : > { %v1266_v22 = vld [vmem:[%s1256_s12 + $0x8] sm:$0xff]  ;;  %s6706_s12 = sshll.u32 %s6182_s5, 3 }
 0x84c   : > { %v2306_v23 = vpop.f32.mrf.mxu1 }
 0x84d   : > { %v2307_v24 = vadd.f32 %v2306_v23, %v6304_v29 }
 0x84e   : > { %v4636_v26 = vpop.f32.mrf.mxu1 }
 0x84f   : > { %v2310_v27 = vsel %vm1520_vm2, %v2307_v24, -inf }
 0x850   : > { %2311 = vmax.xlane.f32.xlu0 %v2310_v27 }
 0x8d9   : > { %v2312_v28 = vpop.xlane.xlu0 %2311 }
 0x8da   : > { %v2313_v30 = vsub.f32 %v2307_v24, %v2312_v28 }
 0x8dc   : > { %v2314_v31 = vmul.f32 1.442695, %v2313_v30 }
 0x8de   : > { %5089 = vpow2.f32 %v2314_v31 }
 0x8eb   : > { %v5090_v32 = vpop.eup %5089 }
 0x8ec   : > { %v2316_v33 = vsel %vm1520_vm2, %v5090_v32, 0.0 }
 0x8ed   : > { %2317 = vadd.xlane.f32.xlu1 %v2316_v33  ;;  %v4407_v33 = vld [vmem:[#allocation19] ss:$0 sm:$0xff] }
 0x8fe   : > { %2321 = vrot.lane.b32.xlu1 %v6294_v25, %s5800_s4 }
 0x909   : > { %v2227_v36 = vpop.f32.mrf.mxu0 }
 0x90a   : > { %v2231_v29 = vadd.f32 %v2227_v36, %v1990_v35  ;;  %v6433_v35 = vld [vmem:[%s6701_s25] sm:$0xff]  ;;  %s1251_s25 = scalar_lea.vmem [#allocation34], %s6706_s12 }
 0x90b   : > { %v4631_v37 = vpop.f32.mrf.mxu0  ;;  %s4021_s3 = sshll.u32 %s1251_s25, 4  ;;  %s4022_s3 = int_to_ptr.vmem [resolvable:$true] %s4021_s3 }
 0x976   : > { %v2318_v38 = vpop.xlane.xlu1 %2317 }
 0x977   : > { %5091 = vrcp.f32 %v2318_v38 }
 0x97a   : > { %v2322_v39 = vpop.permute.xlu1 %2321 }
 0x97b   : > { %4638 = vmatpush3.msra.mxu0 %v2322_v39 }
 0x97c   : > { %4647 = vmatprep.subr.mxu0 %v5796_v0 }
 0x984   : > { %v5092_v40 = vpop.eup %5091 }
 0x985   : > { %v2320_v41 = vmul.f32 %v5092_v40, %v5090_v32 }
 0x987   : > { %4640 = vmatmul.mubr.msk.f32.vlgmr.msra.gmra.mxu0 %vm1520_vm2, %v2320_v41 }
 0x988   : > { %4655 = vmatprep.mubr.msk.f32.mxu0 %vm5797_vm0, %v5796_v0  ;;  %4648 = vmatpush3.msra.mxu0 %v2514_v60 }
 0x989   : > { %4649 = vmatprep.subr.mxu0 %v5796_v0 }
 0x98a   : > { %4650 = vmatpush3.msra.mxu0 %v2513_v61 }
 0x98b   : > { %4651 = vmatprep.subr.mxu0 %v5796_v0 }
 0x98c   : > { %4652 = vmatpush3.msra.mxu0 %v2512_v62  ;;  %v2781_v62 = vld [vmem:[#allocation20 + $0x8] sm:$0xff] }
 0x98d   : > { %4653 = vmatprep.subr.mxu0 %v5796_v0 }
 0x98e   : > { %4654 = vmatpush3.msra.mxu0 %v2511_v63 }
 0x98f   : > { %4669 = vmatprep.subr.mxu0 %v2691_v16 }
 0xa47   : > { %v2393_v25 = vpop.f32.mrf.mxu0 }
 0xa48   : > { %4645 = vmatmul.mubr.msk.f32.vlgmr.msra.gmra.mxu1 %vm1520_vm2, %v2393_v25 }
 0xa49   : > { %v4641_v42 = vpop.f32.mrf.mxu0  ;;  %4659 = vmatpush3.msra.mxu1 %v2599_v55  ;;  %4666 = vmatprep.mubr.msk.f32.mxu1 %vm1279_vm1, %v1263_v58 }
 0xa4a   : > { %4660 = vmatprep.subr.mxu1 %v2598_v56 }
 0xa4b   : > { %4661 = vmatpush3.msra.mxu1 %v2598_v56 }
 0xb08   : > { %v2466_v43 = vpop.f32.mrf.mxu1 }
 0xb09   : > { %v2470_v45 = vadd.f32 %v2466_v43, %v2231_v29 }
 0xb0a   : > { %v4646_v46 = vpop.f32.mrf.mxu1 }
 0xb0b   : > { %v2478_v47 = vadd.f32 %v4399_v44, %v2470_v45 }
 0xb0d   : > { %v2479_v48 = vadd.f32 %v2478_v47, %v6247_v5  ;;  %v2597_v5 = vld [vmem:[#allocation13 + $0x8] sm:$0xff] }
 0xb0e   : > { %4662 = vmatprep.subr.mxu1 %v2597_v5 }
 0xb0f   : > { %v2480_v49 = vsel %vm1279_vm1, %v2479_v48, 0.0  ;;  %4663 = vmatpush3.msra.mxu1 %v2597_v5  ;;  %v2780_v5 = vld [vmem:[#allocation20] sm:$0xff] }
 0xb10   : > { %2481 = vadd.xlane.f32.xlu1 %v2480_v49  ;;  %4664 = vmatprep.subr.mxu1 %v2596_v57 }
 0xb11   : > { %4665 = vmatpush3.msra.mxu1 %v2596_v57 }
 0xb12   : > { %4667 = vmatmul.mubr.msk.f32.vlgmr.msra.gmra.mxu1 %vm1279_vm1, %v1264_v59  ;;  %4680 = vmatprep.subr.mxu1 %v5796_v0 }
 0xb13   : > { %4684 = vmatprep.mubr.msk.f32.mxu1 %vm5797_vm0, %v5796_v0 }
 0xb99   : > { %v2482_v50 = vpop.xlane.xlu1 %2481 }
 0xb9a   : > { %v2484_v51 = vmul.f32 0.03125, %v2482_v50 }
 0xb9c   : > { %v2485_v52 = vsub.f32 %v2479_v48, %v2484_v51 }
 0xb9e   : > { %v2486_v53 = vmul.f32 %v2485_v52, %v2485_v52 }
 0xba0   : > { %v2487_v54 = vsel %vm1279_vm1, %v2486_v53, 0.0 }
 0xba1   : > { %2488 = vadd.xlane.f32.xlu0 %v2487_v54 }
 0xbd2   : > { %v4668_v12 = vpop.f32.mrf.mxu1 }
 0xbd3   : > { %v6397_v13 = vadd.f32 %v4668_v12, %v4404_v11 }
 0xbd4   : > { %v2679_v14 = vpop.f32.mrf.mxu1 }
 0xbd5   : > { %2952 = vrot.lane.b32.xlu0 %v6397_v13, %s5798_s9  ;;  %4681 = vmatpush3.xpose.msk.msra.mxu1 %vm1520_vm2, %v6397_v13  ;;  %v6403_v15 = vadd.f32 %v4404_v11, %v2679_v14 }
 0xbd6   : > { %4682 = vmatprep.subr.mxu1 %v5796_v0 }
 0xbd9   : > { %2950 = vrot.lane.b32.xlu0 %v6403_v15, %s5798_s9  ;;  %4683 = vmatpush3.xpose.msk.msra.mxu1 %vm1520_vm2, %v6403_v15 }
 0xbda   : > { %4694 = vmatprep.subr.mxu1 %v5796_v0 }
 0xc2a   : > { %v2489_v1 = vpop.xlane.xlu0 %2488 }
 0xc2b   : > { %v2490_v2 = vmul.f32 0.03125, %v2489_v1 }
 0xc2d   : > { %v2491_v3 = vadd.f32 1e-05, %v2490_v2 }
 0xc2f   : > { %5093 = vrsqrt.f32 %v2491_v3 }
 0xc3c   : > { %v5094_v4 = vpop.eup %5093 }
 0xc3d   : > { %v2493_v7 = vmul.f32 %v5094_v4, %v2485_v52 }
 0xc3f   : > { %v2501_v9 = vmul.f32 %v4400_v6, %v2493_v7 }
 0xc41   : > { %v6393_v10 = vadd.f32 %v4401_v8, %v2501_v9 }
 0xc43   : > { %4656 = vmatmul.mubr.msk.f32.vlgmr.msra.gmra.mxu0 %vm1279_vm1, %v6393_v10 }
 0xc44   : > { %4670 = vmatpush3.msra.mxu0 %v2691_v16  ;;  %4677 = vmatprep.mubr.msk.f32.mxu0 %vm1279_vm1, %v1265_v18 }
 0xc45   : > { %4671 = vmatprep.subr.mxu0 %v2690_v17 }
 0xc46   : > { %4672 = vmatpush3.msra.mxu0 %v2690_v17 }
 0xc47   : > { %4673 = vmatprep.subr.mxu0 %v2689_v19  ;;  %v2953_v26 = vpop.permute.xlu0 %2952 }
 0xc48   : > { %4674 = vmatpush3.msra.mxu0 %v2689_v19 }
 0xc49   : > { %4675 = vmatprep.subr.mxu0 %v2688_v20 }
 0xc4a   : > { %4676 = vmatpush3.msra.mxu0 %v2688_v20 }
 0xc4b   : > { %4678 = vmatmul.mubr.msk.f32.vlgmr.msra.gmra.mxu0 %vm1279_vm1, %v1266_v22  ;;  %4687 = vmatprep.subr.mxu0 %v5796_v0  ;;  %v2951_v30 = vpop.permute.xlu0 %2950 }
 0xc4c   : > { %4691 = vmatprep.mubr.msk.f32.mxu0 %vm5797_vm0, %v5796_v0 }
 0xd03   : > { %v2591_v23 = vpop.f32.mrf.mxu0 }
 0xd04   : > { %v2592_v24 = vadd.f32 %v4402_v21, %v2591_v23 }
 0xd05   : > { %v4657_v27 = vpop.f32.mrf.mxu0 }
 0xd06   : > { %v2595_v28 = vmul.f32 0.35355338, %v2592_v24 }
 0xd08   : > { %2948 = vrot.lane.b32.xlu1 %v2595_v28, %s5798_s9  ;;  %4685 = vmatmul.mubr.msk.f32.vlgmr.msra.gmra.mxu1 %vm1520_vm2, %v2595_v28 }
 0xd09   : > { %4695 = vmatpush3.xpose.msk.msra.mxu1 %vm1520_vm2, %v2953_v26  ;;  %4698 = vmatprep.mubr.msk.f32.mxu1 %vm5797_vm0, %v5796_v0 }
 0xd0a   : > { %4696 = vmatprep.subr.mxu1 %v5796_v0 }
 0xd0b   : > { %v4679_v32 = vpop.f32.mrf.mxu0 }
 0xd0c   : > { %v6430_v34 = vadd.f32 %v4679_v32, %v4407_v33 }
 0xd0d   : > { %4697 = vmatpush3.xpose.msk.msra.mxu1 %vm1520_vm2, %v2951_v30  ;;  %v2771_v36 = vpop.f32.mrf.mxu0 }
 0xd0e   : > { %4713 = vmatprep.subr.mxu1 %v5796_v0  ;;  %v6435_v29 = vadd.f32 %v4407_v33, %v2771_v36  ;;  %4688 = vmatpush3.msra.mxu0 %v6430_v34 }
 0xd0f   : > { %4689 = vmatprep.subr.mxu0 %v5796_v0 }
 0xd10   : > { %4690 = vmatpush3.msra.mxu0 %v6435_v29 }
 0xd11   : > { %4701 = vmatprep.subr.mxu0 %v5796_v0 }
 0xd7a   : > { %v2949_v31 = vpop.permute.xlu1 %2948 }
 0xd7b   : > { %4699 = vmatmul.mubr.msk.f32.vlgmr.msra.gmra.mxu1 %vm1520_vm2, %v2949_v31 }
 0xd7c   : > { %4715 = vmatprep.mubr.msk.f32.mxu1 %vm5797_vm0, %v5796_v0  ;;  %4714 = vmatpush3.msra.mxu1 %v2780_v5 }
 0xd7d   : > { %4725 = vmatprep.subr.mxu1 %v5796_v0 }
 0xdc8   : > { %v2859_v37 = vpop.f32.mrf.mxu1 }
 0xdc9   : > { %v2860_v38 = vadd.f32 %v2859_v37, %v6433_v35 }
 0xdca   : > { %v4686_v39 = vpop.f32.mrf.mxu1 }
 0xdcb   : > { %v2864_v40 = vsel %vm2863_vm3, %v2860_v38, -inf }
 0xdcc   : > { %2865 = vmax.xlane.f32.xlu0 %v2864_v40 }
 0xe3b   : > { %v3026_v41 = vpop.f32.mrf.mxu1 }
 0xe3c   : > { %v3027_v25 = vadd.f32 %v3026_v41, %v6433_v35  ;;  %v2782_v41 = vld [vmem:[#allocation20 + $0x10] sm:$0xff] }
 0xe3d   : > { %v4700_v42 = vpop.f32.mrf.mxu1 }
 0xe3e   : > { %v3030_v43 = vsel %vm2863_vm3, %v3027_v25, -inf }
 0xe3f   : > { %3031 = vmax.xlane.f32.xlu1 %v3030_v43 }
 0xe50   : > { %3043 = vrot.lane.b32.xlu1 %v6435_v29, %s5798_s9 }
 0xe54   : > { %3268 = vrot.lane.b32.xlu1 %v2595_v28, %s5799_s28 }
 0xe55   : > { %v2866_v44 = vpop.xlane.xlu0 %2865 }
 0xe56   : > { %v2867_v45 = vsub.f32 %v2860_v38, %v2866_v44 }
 0xe58   : > { %v2868_v46 = vmul.f32 1.442695, %v2867_v45  ;;  %3516 = vrot.lane.b32.xlu1 %v6403_v15, %s5800_s4 }
 0xe5a   : > { %5095 = vpow2.f32 %v2868_v46 }
 0xe67   : > { %v5096_v47 = vpop.eup %5095 }
 0xe68   : > { %v2870_v48 = vsel %vm2863_vm3, %v5096_v47, 0.0 }
 0xe69   : > { %2871 = vadd.xlane.f32.xlu0 %v2870_v48 }
 0xec8   : > { %v3032_v49 = vpop.xlane.xlu1 %3031 }
 0xec9   : > { %v3033_v50 = vsub.f32 %v3027_v25, %v3032_v49 }
 0xecb   : > { %v3034_v51 = vmul.f32 1.442695, %v3033_v50 }
 0xecc   : > { %v3044_v59 = vpop.permute.xlu1 %3043 }
 0xecd   : > { %5097 = vpow2.f32 %v3034_v51 }
 0xed0   : > { %v3269_v7 = vpop.permute.xlu1 %3268 }
 0xed4   : > { %v3517_v9 = vpop.permute.xlu1 %3516 }
 0xeda   : > { %v5098_v52 = vpop.eup %5097 }
 0xedb   : > { %v3036_v53 = vsel %vm2863_vm3, %v5098_v52, 0.0 }
 0xedc   : > { %3037 = vadd.xlane.f32.xlu0 %v3036_v53 }
 0xef2   : > { %v2872_v54 = vpop.xlane.xlu0 %2871  ;;  %3045 = vrot.lane.b32.xlu0 %v6430_v34, %s5798_s9  ;;  %s6702_s9 = sld [smem:[#allocation68_spill]] }
 0xef3   : > { %5099 = vrcp.f32 %v2872_v54 }
 0xef6   : > { %3272 = vrot.lane.b32.xlu0 %v6397_v13, %s5799_s28 }
 0xefa   : > { %3270 = vrot.lane.b32.xlu0 %v6403_v15, %s5799_s28 }
 0xefe   : > { %3518 = vrot.lane.b32.xlu0 %v6397_v13, %s5800_s4 }
 0xf00   : > { %v5100_v55 = vpop.eup %5099 }
 0xf01   : > { %v2874_v56 = vmul.f32 %v5100_v55, %v5096_v47  ;;  %v2783_v47 = vld [vmem:[#allocation20 + $0x18] sm:$0xff]  ;;  %v4430_v55 = vld [vmem:[#allocation22] ss:$0 sm:$0xff] }
 0xf02   : > { %3514 = vrot.lane.b32.xlu0 %v2595_v28, %s5800_s4 }
 0xf03   : > { %4692 = vmatmul.mubr.msk.f32.vlgmr.msra.gmra.mxu0 %vm2863_vm3, %v2874_v56 }
 0xf04   : > { %4705 = vmatprep.mubr.msk.f32.mxu0 %vm5797_vm0, %v5796_v0 }
 0xf65   : > { %v3038_v57 = vpop.xlane.xlu0 %3037 }
 0xf66   : > { %5101 = vrcp.f32 %v3038_v57 }
 0xf69   : > { %v3046_v58 = vpop.permute.xlu0 %3045 }
 0xf6a   : > { %4702 = vmatpush3.msra.mxu0 %v3046_v58 }
 0xf6b   : > { %4703 = vmatprep.subr.mxu0 %v5796_v0 }
 0xf6c   : > { %4704 = vmatpush3.msra.mxu0 %v3044_v59 }
 0xf6d   : > { %4708 = vmatprep.subr.mxu0 %v5796_v0  ;;  %v3273_v2 = vpop.permute.xlu0 %3272 }
 0xf71   : > { %v3271_v6 = vpop.permute.xlu0 %3270 }
 0xf73   : > { %v5102_v60 = vpop.eup %5101 }
 0xf74   : > { %v3040_v61 = vmul.f32 %v5102_v60, %v5098_v52 }
 0xf75   : > { %v3519_v8 = vpop.permute.xlu0 %3518 }
 0xf76   : > { %4706 = vmatmul.mubr.msk.f32.vlgmr.msra.gmra.mxu0 %vm2863_vm3, %v3040_v61 }
 0xf77   : > { %4709 = vmatpush3.msra.mxu0 %v2781_v62  ;;  %4710 = vmatprep.mubr.msk.f32.mxu0 %vm5797_vm0, %v5796_v0 }
 0xf78   : > { %4718 = vmatprep.subr.mxu0 %v5796_v0 }
 0xf79   : > { %v3515_v11 = vpop.permute.xlu0 %3514 }
 0xfc3   : > { %v2944_v63 = vpop.f32.mrf.mxu0 }
 0xfc4   : > { %4716 = vmatmul.mubr.msk.f32.vlgmr.msra.gmra.mxu1 %vm1520_vm2, %v2944_v63 }
 0xfc5   : > { %v4693_v1 = vpop.f32.mrf.mxu0  ;;  %4729 = vmatprep.mubr.msk.f32.mxu1 %vm5797_vm0, %v5796_v0 }
0x1036   : > { %v3118_v3 = vpop.f32.mrf.mxu0 }
0x1037   : > { %4711 = vmatmul.mubr.msk.f32.vlgmr.msra.gmra.mxu0 %vm1520_vm2, %v3118_v3  ;;  %v3800_v3 = vld [vmem:[#allocation29 + $0x10] sm:$0xff] }
0x1038   : > { %4719 = vmatpush3.xpose.msk.msra.mxu0 %vm1520_vm2, %v3273_v2  ;;  %v4707_v4 = vpop.f32.mrf.mxu0  ;;  %4722 = vmatprep.mubr.msk.f32.mxu0 %vm5797_vm0, %v5796_v0  ;;  %v3801_v2 = vld [vmem:[#allocation29 + $0x18] sm:$0xff] }
0x1039   : > { %4720 = vmatprep.subr.mxu0 %v5796_v0  ;;  %v3798_v4 = vld [vmem:[#allocation29] sm:$0xff] }
0x103c   : > { %4721 = vmatpush3.xpose.msk.msra.mxu0 %vm1520_vm2, %v3271_v6  ;;  %v3898_v6 = vld [vmem:[%s6702_s9 + $0x78] sm:$0xff] }
0x103d   : > { %4737 = vmatprep.subr.mxu0 %v5796_v0 }
0x103f   : > { %4723 = vmatmul.mubr.msk.f32.vlgmr.msra.gmra.mxu0 %vm1520_vm2, %v3269_v7  ;;  %v3897_v7 = vld [vmem:[%s6702_s9 + $0x70] sm:$0xff] }
0x1040   : > { %4738 = vmatpush3.xpose.msk.msra.mxu0 %vm1520_vm2, %v3519_v8  ;;  %4741 = vmatprep.mubr.msk.f32.mxu0 %vm5797_vm0, %v5796_v0  ;;  %v3896_v8 = vld [vmem:[%s6702_s9 + $0x68] sm:$0xff] }
0x1041   : > { %4739 = vmatprep.subr.mxu0 %v5796_v0 }
0x1044   : > { %4740 = vmatpush3.xpose.msk.msra.mxu0 %vm1520_vm2, %v3517_v9  ;;  %v3895_v9 = vld [vmem:[%s6702_s9 + $0x60] sm:$0xff] }
0x1045   : > { %4756 = vmatprep.subr.mxu0 %v5796_v0 }
0x1047   : > { %4742 = vmatmul.mubr.msk.f32.vlgmr.msra.gmra.mxu0 %vm1520_vm2, %v3515_v11  ;;  %v3894_v11 = vld [vmem:[%s6702_s9 + $0x58] sm:$0xff] }
0x1048   : > { %4764 = vmatprep.mubr.msk.f32.mxu0 %vm5797_vm0, %v5796_v0  ;;  %4757 = vmatpush3.msra.mxu0 %v3801_v2 }
0x1049   : > { %4758 = vmatprep.subr.mxu0 %v5796_v0 }
0x104a   : > { %4759 = vmatpush3.msra.mxu0 %v3800_v3 }
0x104b   : > { %4760 = vmatprep.subr.mxu0 %v5796_v0 }
0x1084   : > { %v6491_v12 = vpop.f32.mrf.mxu1 }
0x1086   : > { %v4717_v13 = vpop.f32.mrf.mxu1 }
0x1087   : > { %v3892_v13 = vld [vmem:[%s6702_s9 + $0x48] sm:$0xff] }
0x10f7   : > { %v6493_v14 = vpop.f32.mrf.mxu0 }
0x10f8   : > { %v3265_v48 = vadd.f32 %v6491_v12, %v6493_v14  ;;  %v3893_v12 = vld [vmem:[%s6702_s9 + $0x50] sm:$0xff]  ;;  %v3891_v14 = vld [vmem:[%s6702_s9 + $0x40] sm:$0xff] }
0x10f9   : > { %v4712_v15 = vpop.f32.mrf.mxu0 }
0x10fa   : > { %v3890_v15 = vld [vmem:[%s6702_s9 + $0x38] sm:$0xff] }
0x10ff   : > { %v3346_v16 = vpop.f32.mrf.mxu0 }
0x1100   : > { %v3347_v17 = vadd.f32 %v3346_v16, %v6433_v35  ;;  %v3889_v16 = vld [vmem:[%s6702_s9 + $0x30] sm:$0xff] }
0x1101   : > { %v4724_v18 = vpop.f32.mrf.mxu0 }
0x1102   : > { %v3350_v19 = vsel %vm2863_vm3, %v3347_v17, -inf  ;;  %v3887_v18 = vld [vmem:[%s6702_s9 + $0x20] sm:$0xff] }
0x1103   : > { %3351 = vmax.xlane.f32.xlu1 %v3350_v19  ;;  %v3886_v19 = vld [vmem:[%s6702_s9 + $0x18] sm:$0xff] }
0x1107   : > { %v3592_v20 = vpop.f32.mrf.mxu0 }
0x1108   : > { %v3593_v22 = vadd.f32 %v3592_v20, %v6433_v35 }
0x1109   : > { %v4743_v21 = vpop.f32.mrf.mxu0 }
0x110a   : > { %v3596_v23 = vsel %vm2863_vm3, %v3593_v22, -inf }
0x1114   : > { %3361 = vrot.lane.b32.xlu1 %v6435_v29, %s5799_s28 }
0x1138   : > { %3597 = vmax.xlane.f32.xlu1 %v3596_v23 }
0x1149   : > { %3607 = vrot.lane.b32.xlu1 %v6435_v29, %s5800_s4 }
0x118c   : > { %v3352_v24 = vpop.xlane.xlu1 %3351 }
0x118d   : > { %v3353_v26 = vsub.f32 %v3347_v17, %v3352_v24  ;;  %v3888_v17 = vld [vmem:[%s6702_s9 + $0x28] sm:$0xff]  ;;  %v4431_v24 = vld [vmem:[#allocation26] ss:$0 sm:$0xff] }
0x118f   : > { %v3354_v27 = vmul.f32 1.442695, %v3353_v26 }
0x1190   : > { %v3362_v31 = vpop.permute.xlu1 %3361 }
0x1191   : > { %5103 = vpow2.f32 %v3354_v27  ;;  %v4432_v27 = vld [vmem:[#allocation28] ss:$0 sm:$0xff] }
0x119e   : > { %v5104_v28 = vpop.eup %5103 }
0x119f   : > { %v3356_v30 = vsel %vm2863_vm3, %v5104_v28, 0.0 }
0x11a0   : > { %3357 = vadd.xlane.f32.xlu0 %v3356_v30 }
0x11b6   : > { %3363 = vrot.lane.b32.xlu0 %v6430_v34, %s5799_s28  ;;  %s6703_s28 = sld [smem:[#allocation66_spill]] }
0x11c1   : > { %v3598_v32 = vpop.xlane.xlu1 %3597 }
0x11c2   : > { %v3599_v33 = vsub.f32 %v3593_v22, %v3598_v32  ;;  %v3884_v32 = vld [vmem:[%s6702_s9 + $0x8] sm:$0xff] }
0x11c4   : > { %v3600_v35 = vmul.f32 1.442695, %v3599_v33  ;;  %v3883_v33 = vld [vmem:[%s6702_s9] sm:$0xff] }
0x11c5   : > { %v3608_v45 = vpop.permute.xlu1 %3607 }
0x11c6   : > { %5105 = vpow2.f32 %v3600_v35  ;;  %v4433_v35 = vld [vmem:[#allocation31] ss:$0 sm:$0xff] }
0x11d3   : > { %v5106_v36 = vpop.eup %5105 }
0x11d4   : > { %v3602_v37 = vsel %vm2863_vm3, %v5106_v36, 0.0 }
0x11d5   : > { %3603 = vadd.xlane.f32.xlu0 %v3602_v37 }
0x11eb   : > { %3609 = vrot.lane.b32.xlu0 %v6430_v34, %s5800_s4  ;;  %s6704_s4 = sld [smem:[#allocation67_spill]] }
0x1229   : > { %v3358_v29 = vpop.xlane.xlu0 %3357 }
0x122a   : > { %5107 = vrcp.f32 %v3358_v29 }
0x122d   : > { %v3364_v38 = vpop.permute.xlu0 %3363 }
0x122e   : > { %4726 = vmatpush3.msra.mxu1 %v3364_v38 }
0x122f   : > { %4727 = vmatprep.subr.mxu1 %v5796_v0 }
0x1230   : > { %4728 = vmatpush3.msra.mxu1 %v3362_v31  ;;  %v3885_v31 = vld [vmem:[%s6702_s9 + $0x10] sm:$0xff]  ;;  %s5637_s9 = scalar_lea.vmem %s4022_s3, 128 }
0x1231   : > { %4732 = vmatprep.subr.mxu1 %v5796_v0  ;;  %p5638_p1 = scmp.ne.s32.totalorder %s4022_s3, %s5637_s9 }
0x1233   : > { %p5639_p3 = pnand %p5638_p1, %p6707_p13 }
0x1235   : > { %p5640_p8 = pneg %p5639_p3 }
0x1237   : > { %v5108_v39 = vpop.eup %5107 }
0x1238   : > { %v3360_v40 = vmul.f32 %v5108_v39, %v5104_v28  ;;  %v4435_v39 = vld [vmem:[#allocation32] ss:$0 sm:$0xff] }
0x123a   : > { %4730 = vmatmul.mubr.msk.f32.vlgmr.msra.gmra.mxu1 %vm2863_vm3, %v3360_v40 }
0x123b   : > { %4733 = vmatpush3.msra.mxu1 %v2782_v41  ;;  %4734 = vmatprep.mubr.msk.f32.mxu1 %vm5797_vm0, %v5796_v0 }
0x123c   : > { %4744 = vmatprep.subr.mxu1 %v5796_v0 }
0x125e   : > { %v3604_v34 = vpop.xlane.xlu0 %3603 }
0x125f   : > { %5109 = vrcp.f32 %v3604_v34 }
0x1262   : > { %v3610_v43 = vpop.permute.xlu0 %3609 }
0x126c   : > { %v5110_v25 = vpop.eup %5109 }
0x126d   : > { %v3606_v46 = vmul.f32 %v5110_v25, %v5106_v36 }
0x12fa   : > { %v3436_v42 = vpop.f32.mrf.mxu1 }
0x12fb   : > { %4735 = vmatmul.mubr.msk.f32.vlgmr.msra.gmra.mxu1 %vm1520_vm2, %v3436_v42 }
0x12fc   : > { %4745 = vmatpush3.msra.mxu1 %v3610_v43  ;;  %v4731_v44 = vpop.f32.mrf.mxu1  ;;  %4748 = vmatprep.mubr.msk.f32.mxu1 %vm5797_vm0, %v5796_v0 }
0x12fd   : > { %4746 = vmatprep.subr.mxu1 %v5796_v0 }
0x12fe   : > { %4747 = vmatpush3.msra.mxu1 %v3608_v45 }
0x12ff   : > { %4749 = vmatmul.mubr.msk.f32.vlgmr.msra.gmra.mxu1 %vm2863_vm3, %v3606_v46  ;;  %4751 = vmatprep.subr.mxu1 %v5796_v0 }
0x1300   : > { %4753 = vmatprep.mubr.msk.f32.mxu1 %vm5797_vm0, %v5796_v0  ;;  %4752 = vmatpush3.msra.mxu1 %v2783_v47 }
0x1301   : > { %4767 = vmatprep.subr.mxu1 %v5796_v0 }
0x13bb   : > { %v3509_v49 = vpop.f32.mrf.mxu1 }
0x13bc   : > { %v3513_v50 = vadd.f32 %v3509_v49, %v3265_v48 }
0x13bd   : > { %v4736_v51 = vpop.f32.mrf.mxu1 }
0x13be   : > { %v4436_v51 = vld [vmem:[%s6703_s28] ss:$0 sm:$0xff]  ;;  %s5641_s28 = sshll.u32 %s5801_s14, 4  ;;  %s5642_s28 = int_to_ptr.vmem [resolvable:$false] %s5641_s28 }
0x13bf   : > { %v3682_v52 = vpop.f32.mrf.mxu1  ;;  %p5644_p9 = scmp.lt.s32.totalorder %s4022_s3, %s5642_s28 }
0x13c0   : > { %4754 = vmatmul.mubr.msk.f32.vlgmr.msra.gmra.mxu1 %vm1520_vm2, %v3682_v52 }
0x13c1   : > { %v4750_v53 = vpop.f32.mrf.mxu1  ;;  %4799 = vmatprep.mubr.msk.f32.mxu1 %vm5797_vm0, %v5796_v0  ;;  %4768 = vmatpush3.msra.mxu1 %v3898_v6 }
0x13c2   : > { %4769 = vmatprep.subr.mxu1 %v5796_v0  ;;  %v4437_v53 = vld [vmem:[%s6704_s4] ss:$0 sm:$0xff]  ;;  %s5643_s4 = scalar_lea.vmem %s5642_s28, 256 }
0x13c3   : > { %4770 = vmatpush3.msra.mxu1 %v3897_v7  ;;  %p5645_p10 = scmp.lt.s32.totalorder %s5643_s4, %s5637_s9 }
0x13c4   : > { %4771 = vmatprep.subr.mxu1 %v5796_v0 }
0x13c5   : > { %4772 = vmatpush3.msra.mxu1 %v3896_v8  ;;  %p5646_p2 = por %p5645_p10, %p5644_p9 }
0x13c6   : > { %4773 = vmatprep.subr.mxu1 %v5796_v0 }
0x13c7   : > { %4774 = vmatpush3.msra.mxu1 %v3895_v9  ;;  %p5647_p6 = pnand %p5646_p2, %p5640_p8 }
0x13c8   : > { %4775 = vmatprep.subr.mxu1 %v5796_v0 }
0x13c9   : > { %4776 = vmatpush3.msra.mxu1 %v3894_v11 }
0x13ca   : > { %4777 = vmatprep.subr.mxu1 %v5796_v0 }
0x13cb   : > { %4778 = vmatpush3.msra.mxu1 %v3893_v12 }
0x13cc   : > { %4779 = vmatprep.subr.mxu1 %v5796_v0 }
0x13cd   : > { %4780 = vmatpush3.msra.mxu1 %v3892_v13 }
0x13ce   : > { %4781 = vmatprep.subr.mxu1 %v5796_v0 }
0x13cf   : > { %4782 = vmatpush3.msra.mxu1 %v3891_v14 }
0x13d0   : > { %4783 = vmatprep.subr.mxu1 %v5796_v0 }
0x13d1   : > { %4784 = vmatpush3.msra.mxu1 %v3890_v15 }
0x13d2   : > { %4785 = vmatprep.subr.mxu1 %v5796_v0 }
0x13d3   : > { %4786 = vmatpush3.msra.mxu1 %v3889_v16 }
0x13d4   : > { %4787 = vmatprep.subr.mxu1 %v5796_v0 }
0x13d5   : > { %4788 = vmatpush3.msra.mxu1 %v3888_v17 }
0x13d6   : > { %4789 = vmatprep.subr.mxu1 %v5796_v0 }
0x13d7   : > { %4790 = vmatpush3.msra.mxu1 %v3887_v18 }
0x13d8   : > { %4791 = vmatprep.subr.mxu1 %v5796_v0 }
0x13d9   : > { %4792 = vmatpush3.msra.mxu1 %v3886_v19 }
0x13da   : > { %4793 = vmatprep.subr.mxu1 %v5796_v0 }
0x13db   : > { %4794 = vmatpush3.msra.mxu1 %v3885_v31 }
0x13dc   : > { %4795 = vmatprep.subr.mxu1 %v5796_v0 }
0x13dd   : > { %4796 = vmatpush3.msra.mxu1 %v3884_v32 }
0x13de   : > { %4797 = vmatprep.subr.mxu1 %v5796_v0 }
0x13df   : > { %4798 = vmatpush3.msra.mxu1 %v3883_v33 }
0x1480   : > { %v3755_v54 = vpop.f32.mrf.mxu1 }
0x1481   : > { %v3759_v56 = vadd.f32 %v3755_v54, %v3513_v50 }
0x1482   : > { %v4755_v5 = vpop.f32.mrf.mxu1 }
0x1483   : > { %v3767_v57 = vadd.f32 %v4430_v55, %v3759_v56 }
0x1485   : > { %v3768_v58 = vadd.f32 %v3767_v57, %v6393_v10  ;;  %v3799_v10 = vld [vmem:[#allocation29 + $0x8] sm:$0xff] }
0x1486   : > { %4761 = vmatpush3.msra.mxu0 %v3799_v10 }
0x1487   : > { %v3769_v59 = vsel %vm1279_vm1, %v3768_v58, 0.0  ;;  %4762 = vmatprep.subr.mxu0 %v5796_v0 }
0x1488   : > { %3770 = vadd.xlane.f32.xlu1 %v3769_v59  ;;  %4763 = vmatpush3.msra.mxu0 %v3798_v4 }
0x1511   : > { %v3771_v60 = vpop.xlane.xlu1 %3770 }
0x1512   : > { %v3772_v61 = vmul.f32 0.03125, %v3771_v60 }
0x1514   : > { %v3773_v62 = vsub.f32 %v3768_v58, %v3772_v61 }
0x1516   : > { %v3774_v63 = vmul.f32 %v3773_v62, %v3773_v62 }
0x1518   : > { %v3775_v1 = vsel %vm1279_vm1, %v3774_v63, 0.0 }
0x1519   : > { %3776 = vadd.xlane.f32.xlu0 %v3775_v1 }
0x15a2   : > { %v3777_v20 = vpop.xlane.xlu0 %3776 }
0x15a3   : > { %v3778_v21 = vmul.f32 0.03125, %v3777_v20 }
0x15a5   : > { %v3779_v22 = vadd.f32 1e-05, %v3778_v21 }
0x15a7   : > { %5111 = vrsqrt.f32 %v3779_v22 }
0x15b4   : > { %v5112_v23 = vpop.eup %5111 }
0x15b5   : > { %v3781_v26 = vmul.f32 %v5112_v23, %v3773_v62 }
0x15b7   : > { %v3789_v28 = vmul.f32 %v4431_v24, %v3781_v26 }
0x15b9   : > { %v3797_v30 = vadd.f32 %v4432_v27, %v3789_v28 }
0x15bb   : > { %4765 = vmatmul.mubr.msk.f32.vlgmr.msra.gmra.mxu0 %vm1279_vm1, %v3797_v30 }
0x167b   : > { %v3878_v36 = vpop.f32.mrf.mxu0 }
0x167c   : > { %v3879_v37 = vadd.f32 %v4433_v35, %v3878_v36 }
0x167d   : > { %v4766_v29 = vpop.f32.mrf.mxu0 }
0x167e   : > { %v3882_v38 = vmax.f32 %v3879_v37, 0.0 }
0x1680   : > { %4800 = vmatmul.mubr.f32.vlgmr.msra.gmra.mxu1 %v3882_v38 }
0x1740   : > { %v3972_v40 = vpop.f32.mrf.mxu1 }
0x1741   : > { %v3973_v41 = vadd.f32 %v4435_v39, %v3972_v40 }
0x1742   : > { %v4801_v34 = vpop.f32.mrf.mxu1 }
0x1743   : > { %v3976_v25 = vadd.f32 %v3973_v41, %v3797_v30 }
0x1745   : > { %v3977_v42 = vsel %vm1279_vm1, %v3976_v25, 0.0 }
0x1746   : > { %3978 = vadd.xlane.f32.xlu0 %v3977_v42 }
0x17cf   : > { %v3979_v0 = vpop.xlane.xlu0 %3978 }
0x17d0   : > { %v3980_v43 = vmul.f32 0.03125, %v3979_v0 }
0x17d2   : > { %v3981_v44 = vsub.f32 %v3976_v25, %v3980_v43 }
0x17d4   : > { %v3982_v45 = vmul.f32 %v3981_v44, %v3981_v44 }
0x17d6   : > { %v3983_v46 = vsel %vm1279_vm1, %v3982_v45, 0.0 }
0x17d7   : > { %3984 = vadd.xlane.f32.xlu1 %v3983_v46 }
0x1860   : > { %v3985_v47 = vpop.xlane.xlu1 %3984 }
0x1861   : > { %v3986_v48 = vmul.f32 0.03125, %v3985_v47 }
0x1863   : > { %v3987_v49 = vadd.f32 1e-05, %v3986_v48 }
0x1865   : > { %5113 = vrsqrt.f32 %v3987_v49 }
0x1872   : > { %v5114_v50 = vpop.eup %5113 }
0x1873   : > { %v3989_v52 = vmul.f32 %v5114_v50, %v3981_v44 }
0x1875   : > { %v3997_v54 = vmul.f32 %v4436_v51, %v3989_v52 }
0x1877   : > { %v4005_v55 = vadd.f32 %v4437_v53, %v3997_v54 }
0x1879   : > { %4006 = vst.msk [vmem:[%s1251_s25] sm:$0xff] %vm1279_vm1, %v4005_v55 }
0x187a   : > { %5650 = shalt.err (!%p5647_p6)
}
0x187b   : > { %s5651_s2 = scalar_lea.hbm %s4019_s7, 128  ;;  %s5655_s5 = scalar_lea.hbm %s6705_s6, 256 }
0x187c   : > { %p5652_p4 = scmp.ne.s32.totalorder %s4019_s7, %s5651_s2  ;;  %p5656_p11 = scmp.lt.s32.totalorder %s4019_s7, %s6705_s6 }
0x187d   : > { %p5657_p12 = scmp.lt.s32.totalorder %s5655_s5, %s5651_s2 }
0x187e   : > { %p5653_p5 = pnand %p5652_p4, %p6707_p13 }
0x187f   : > { %p5658_p0 = por %p5657_p12, %p5656_p11 }
0x1880   : > { %p5654_p7 = pneg %p5653_p5 }
0x1882   : > { %p5659_p1 = pnand %p5658_p0, %p5654_p7 }
0x1884   : > { %5662 = shalt.err (!%p5659_p1)
}
0x1885   : > { %4880 = dma.vmem_to_hbm [thread:$0]  (%p6707_p13), %s4022_s3, 128, %s4019_s7, %s4008_s8  }
0x1886 PF: > { %s4033_s14 = sand.u32 1, %s5729_s22   ;;  %p6708_p3 = scmp.ne.s32.totalorder %s6669_s16, 0 }
0x1887   : > { %p6709_p8 = scmp.ge.s32.totalorder %s5741_s26, 2  ;;  %s4034_s9 = scalar_lea.sflag [#allocation4], %s4033_s14 }
0x1889   : > { %p4945_p9 = pnand %p6709_p8, %p6708_p3 }
0x188b   : > { %p4946_p10 = pneg %p4945_p9 }
0x188d   : > { %5724 = dma.done.wait (%p4946_p10), %s4034_s9, 128  }
0x188e   : > { %5726 = vsyncadd (%p4946_p10), %s4034_s9, 4294967168  ;;  %p86_p2 = scmp.ge.s32.totalorder %s6131_s11, 4   ;;  %s6710_s22 = smov %s5733_s23 }
0x188f   : > { %s6711_s23 = smov %s5737_s0  ;;  %s6712_s0 = smov %s6143_s1 }
0x1890   : > { %s6713_s26 = smov %s6131_s11  ;;  %88 = sbr.rel (!%p86_p2) target bundleno = 75 (0x4b), region = 302 }
0x1895   :  { %4039 = vsyncpa [#allocation3], 1 }
0x1896   :  { %4041 = vsyncpa [#allocation3 + $0x1], 1 }
0x1897   :  { %4042 = vsyncpa [#allocation6], 1 }
0x1898   :  { %4043 = vsyncpa [#allocation9], 1 }
0x1899   :  { %4044 = vsyncpa [#allocation12], 1 }
0x189a   :  { %4045 = vsyncpa [#allocation15], 1 }
0x189b   :  { %4046 = vsyncpa [#allocation18], 1 }
0x189c   :  { %4047 = vsyncpa [#allocation21], 1 }
0x189d   :  { %4048 = vsyncpa [#allocation24], 1 }
0x189e   :  { %4049 = vsyncpa [#allocation27], 1 }
0x189f   :  { %4050 = vsyncpa [#allocation30], 1 }
0x18a0   :  { %4051 = vsyncpa [#allocation33], 1 }
0x18a1   :  { %4052 = vsyncpa [#allocation4], 1 }
0x18a2   :  { %4054 = vsyncpa [#allocation4 + $0x1], 1 }

</bundles_post_ra>
